<compile_context>
chip_gen: v5e
topology: v5e:2x2
jax: 0.10.0
libtpu: 0.0.40
codegen_flags: <defaults>
</compile_context>

<pallas_src>
import functools

import jax
import jax.numpy as jnp
from jax.experimental import pallas as pl
from jax.experimental.pallas import tpu as pltpu

IN_FEATURES = 768
NUM_CLASSES = 4
LANE = 128
SUBLANE = 8


def _chip_generation():
    """Best-effort TPU generation detection ('v4'/'v5'/'v6'/'v7') from device_kind."""
    try:
        kind = jax.devices()[0].device_kind.lower()
    except Exception:
        return None
    for gen in ("v7", "v6", "v5", "v4"):
        if gen in kind:
            return gen
    return None


def _default_tile_and_buffers():
    gen = _chip_generation()
    if gen == "v7":
        # ~3.2 TB/s per TC: need a bigger tile to amortize the ~0.35 us/step
        # overhead; an extra x buffer hides DMA-issue jitter.
        return 2048, 3
    # v5e / v6e (and unknown): 1024 is >=85% of roofline and VMEM-safe.
    return 1024, 2


_DEFAULT_TILE_B, _DEFAULT_NUM_BUFFERS = _default_tile_and_buffers()


def _round_up(x, m):
    return ((x + m - 1) // m) * m


def _vmem_limit_bytes(tile_b, num_buffers):
    """Explicit scoped-VMEM budget: buffered x tiles + lane-padded out + weights."""
    x_bytes = tile_b * IN_FEATURES * 4 * num_buffers          # streamed x tiles
    out_bytes = tile_b * LANE * 4 * 2                         # (tile_b, 4) pads to lane 128, 2 bufs
    w_bytes = IN_FEATURES * LANE * 4 + SUBLANE * LANE * 4     # resident weight + bias (padded)
    budget = (x_bytes + out_bytes + w_bytes) * 3 // 2         # +50% headroom
    return int(max(budget, 16 << 20))


def _make_x_spec(tile_b, num_buffers):
    index_map = lambda i: (i, 0)
    if num_buffers != 2:
        try:
            return pl.BlockSpec((tile_b, IN_FEATURES), index_map,
                                pipeline_mode=pl.Buffered(num_buffers))
        except TypeError:
            # Older BlockSpec signature without pipeline_mode: fall back to default.
            pass
    return pl.BlockSpec((tile_b, IN_FEATURES), index_map)


def _linear_logsoftmax_kernel(x_ref, wt_ref, b_ref, o_ref):
    # x_ref: (TILE_B, 768)  wt_ref: (768, 4)  b_ref: (1, 4)  o_ref: (TILE_B, 4)
    x = x_ref[...]
    # MXU matmul, f32 accumulation. HIGHEST precision is free: kernel is DMA-bound.
    logits = jnp.dot(x, wt_ref[...],
                     preferred_element_type=jnp.float32,
                     precision=jax.lax.Precision.HIGHEST) + b_ref[...]
    # Numerically-stable log_softmax over the class axis (dim=1), fused epilogue:
    # out = logits - (m + log(sum(exp(logits - m))))  -> one fewer VPU pass.
    m = jnp.max(logits, axis=-1, keepdims=True)
    lse = m + jnp.log(jnp.sum(jnp.exp(logits - m), axis=-1, keepdims=True))
    o_ref[...] = (logits - lse).astype(o_ref.dtype)


def prepare_params(weight, bias):
    """Hoist layout prep out of the per-call path (do once at init).

    weight: (4, 768) PyTorch nn.Linear layout -> (768, 4) so the kernel does x @ Wt
    bias:   (4,)                              -> (1, 4)
    """
    return jnp.asarray(weight).T, jnp.asarray(bias).reshape(1, NUM_CLASSES)


@functools.partial(jax.jit, static_argnames=("tile_b", "num_buffers"))
def model1_forward(x, wt, b2d, *, tile_b=None, num_buffers=None):
    """x: (B, 768) f32, wt: (768, 4) f32, b2d: (1, 4) f32 -> (B, 4) f32 log-probs."""
    B = x.shape[0]
    if tile_b is None:
        # Generation-aware tile; shrink for tiny batches (keep sublane alignment).
        tile_b = min(_DEFAULT_TILE_B, _round_up(max(B, 1), SUBLANE))
    if num_buffers is None:
        num_buffers = _DEFAULT_NUM_BUFFERS if tile_b >= _DEFAULT_TILE_B else 2

    grid = (pl.cdiv(B, tile_b),)

    cost = pl.CostEstimate(
        flops=2 * B * IN_FEATURES * NUM_CLASSES,
        transcendentals=B * NUM_CLASSES,                    # exp() in the epilogue
        bytes_accessed=(B * IN_FEATURES * 4                 # stream x
                        + B * NUM_CLASSES * 4               # write output
                        + IN_FEATURES * NUM_CLASSES * 4     # weight (resident)
                        + NUM_CLASSES * 4),                 # bias
    )

    return pl.pallas_call(
        _linear_logsoftmax_kernel,
        out_shape=jax.ShapeDtypeStruct((B, NUM_CLASSES), jnp.float32),
        grid=grid,
        in_specs=[
            # x: streamed tile-by-tile over the batch (auto multi-buffered).
            _make_x_spec(tile_b, num_buffers),
            # weight / bias: constant index map -> single block resident in VMEM.
            pl.BlockSpec((IN_FEATURES, NUM_CLASSES), lambda i: (0, 0)),
            pl.BlockSpec((1, NUM_CLASSES), lambda i: (0, 0)),
        ],
        out_specs=pl.BlockSpec((tile_b, NUM_CLASSES), lambda i: (i, 0)),
        compiler_params=pltpu.CompilerParams(
            # Batch tiles are independent -> shard grid across both TCs on v7x.
            dimension_semantics=("parallel",),
            # Explicit budget so larger tiles never hit the scoped-VMEM default.
            vmem_limit_bytes=_vmem_limit_bytes(tile_b, num_buffers),
        ),
        cost_estimate=cost,
    )(x, wt, b2d)


def init_params(key):
    """Deterministic nn.Linear-style init: U(-1/sqrt(fan_in), 1/sqrt(fan_in))."""
    kw, kb = jax.random.split(key)
    bound = 1.0 / jnp.sqrt(jnp.float32(IN_FEATURES))
    weight = jax.random.uniform(
        kw, (NUM_CLASSES, IN_FEATURES), jnp.float32, minval=-bound, maxval=bound)
    bias = jax.random.uniform(
        kb, (NUM_CLASSES,), jnp.float32, minval=-bound, maxval=bound)
    return weight, bias


if __name__ == "__main__":
    key = jax.random.PRNGKey(0)
    k_x, k_p, k_x2 = jax.random.split(key, 3)

    weight, bias = init_params(k_p)
    wt, b2d = prepare_params(weight, bias)   # layout prep done once, not per call

    def ref_fn(xx):
        return jax.nn.log_softmax(
            jnp.dot(xx, weight.T, precision=jax.lax.Precision.HIGHEST) + bias, axis=1)

    # Small-batch check (single grid step, generation-default tile shrunk to B).
    B = 8
    x = jax.random.normal(k_x, (B, IN_FEATURES), jnp.float32)
    out = jax.block_until_ready(model1_forward(x, wt, b2d))
    assert out.shape == (B, NUM_CLASSES)
    assert jnp.allclose(out, ref_fn(x), atol=1e-5, rtol=1e-5)

    # Multi-tile check: grid > 1 with a partial last tile (40 rows, tile 16).
    B2 = 40
    x2 = jax.random.normal(k_x2, (B2, IN_FEATURES), jnp.float32)
    out2 = jax.block_until_ready(model1_forward(x2, wt, b2d, tile_b=16))
    assert out2.shape == (B2, NUM_CLASSES)
    assert jnp.allclose(out2, ref_fn(x2), atol=1e-5, rtol=1e-5)

    # Exercise the multi-buffered x-stream path explicitly (grid of 5 tiles of 8).
    out3 = jax.block_until_ready(model1_forward(x2, wt, b2d, tile_b=8, num_buffers=3))
    assert jnp.allclose(out3, ref_fn(x2), atol=1e-5, rtol=1e-5)

    print("KERNEL_OK")
</pallas_src>

<mosaic_0001>
module attributes {stable_mosaic.version = 11 : i64} {
  func.func @_linear_logsoftmax_kernel(%arg0: i32, %arg1: memref<8x768xf32, #tpu.memory_space<vmem>>, %arg2: memref<768x4xf32, #tpu.memory_space<vmem>>, %arg3: memref<1x4xf32, #tpu.memory_space<vmem>>, %arg4: memref<8x4xf32, #tpu.memory_space<vmem>>) attributes {dimension_semantics = [#tpu.dimension_semantics<parallel>], iteration_bounds = array<i64: 1>, scalar_prefetch = 0 : i64, scratch_operands = 0 : i64, tpu.core_type = #tpu.core_type<tc>, window_params = [{transform_indices = @transform_0, window_bounds = array<i64: 8, 768>}, {pipeline_mode = #tpu.pipeline_mode<synchronous>, transform_indices = @transform_1, window_bounds = array<i64: 768, 4>}, {pipeline_mode = #tpu.pipeline_mode<synchronous>, transform_indices = @transform_2, window_bounds = array<i64: 1, 4>}, {transform_indices = @transform_3, window_bounds = array<i64: 8, 4>}]} {
    %c0 = arith.constant 0 : index
    %c0_0 = arith.constant 0 : index
    %0 = vector.load %arg1[%c0, %c0_0] : memref<8x768xf32, #tpu.memory_space<vmem>>, vector<8x768xf32>
    %c0_1 = arith.constant 0 : index
    %c0_2 = arith.constant 0 : index
    %1 = vector.load %arg2[%c0_1, %c0_2] : memref<768x4xf32, #tpu.memory_space<vmem>>, vector<768x4xf32>
    %cst = arith.constant dense<0.000000e+00> : vector<8x4xf32>
    %2 = tpu.matmul %0, %1, %cst {dimension_numbers = #tpu.dot_dimension_numbers<[1], [0], [0], [1], [0, 0, 1, 1], [], []>, precision = #tpu.contract_precision<fp32>} : vector<8x768xf32>, vector<768x4xf32>, vector<8x4xf32> -> vector<8x4xf32>
    %c0_3 = arith.constant 0 : index
    %c0_4 = arith.constant 0 : index
    %3 = vector.load %arg3[%c0_3, %c0_4] : memref<1x4xf32, #tpu.memory_space<vmem>>, vector<1x4xf32>
    %4 = vector.broadcast %3 : vector<1x4xf32> to vector<8x4xf32>
    %5 = arith.addf %2, %4 : vector<8x4xf32>
    %cst_5 = arith.constant dense<0xFF800000> : vector<8xf32>
    %6 = vector.multi_reduction <maximumf>, %5, %cst_5 [1] : vector<8x4xf32> to vector<8xf32>
    %7 = vector.shape_cast %6 : vector<8xf32> to vector<8x1xf32>
    %8 = vector.broadcast %7 : vector<8x1xf32> to vector<8x4xf32>
    %9 = arith.subf %5, %8 : vector<8x4xf32>
    %10 = math.exp %9 : vector<8x4xf32>
    %cst_6 = arith.constant dense<0.000000e+00> : vector<8xf32>
    %11 = vector.multi_reduction <add>, %10, %cst_6 [1] : vector<8x4xf32> to vector<8xf32>
    %12 = vector.shape_cast %11 : vector<8xf32> to vector<8x1xf32>
    %13 = math.log %12 : vector<8x1xf32>
    %14 = arith.addf %7, %13 : vector<8x1xf32>
    %15 = vector.broadcast %14 : vector<8x1xf32> to vector<8x4xf32>
    %16 = arith.subf %5, %15 : vector<8x4xf32>
    %c0_7 = arith.constant 0 : index
    %c0_8 = arith.constant 0 : index
    %17 = vector.load %arg4[%c0_7, %c0_8] : memref<8x4xf32, #tpu.memory_space<vmem>>, vector<8x4xf32>
    tpu.vector_store %arg4[%c0_7, %c0_8], %16 {strides = array<i32>} : memref<8x4xf32, #tpu.memory_space<vmem>>, vector<8x4xf32>,
    return
  }
  func.func @transform_0(%arg0: i32) -> (i32, i32) {
    %c0_i32 = arith.constant 0 : i32
    %c0_i32_0 = arith.constant 0 : i32
    return %arg0, %c0_i32 : i32, i32
  }
  func.func @transform_1(%arg0: i32) -> (i32, i32) {
    %c0_i32 = arith.constant 0 : i32
    %c0_i32_0 = arith.constant 0 : i32
    %c0_i32_1 = arith.constant 0 : i32
    return %c0_i32, %c0_i32_0 : i32, i32
  }
  func.func @transform_2(%arg0: i32) -> (i32, i32) {
    %c0_i32 = arith.constant 0 : i32
    %c0_i32_0 = arith.constant 0 : i32
    %c0_i32_1 = arith.constant 0 : i32
    return %c0_i32, %c0_i32_0 : i32, i32
  }
  func.func @transform_3(%arg0: i32) -> (i32, i32) {
    %c0_i32 = arith.constant 0 : i32
    %c0_i32_0 = arith.constant 0 : i32
    return %arg0, %c0_i32 : i32, i32
  }
}

</mosaic_0001>

<bundles_post_ra>
// kernel: model1_forward.1
= control target key start
LH: loop header
LB: loop body
LE: loop exit
PB: predicated region body
PF: predicated region fallthrough
CT: control target
= control target key end

     0   :  { %vm2166_vm0 = vcmask 31744   ;;  %s4051_s1 = inlined_call_operand.vmem [shape: f32[768,4], index: 1, kind: input, shape index: {}]   ;;  %s4052_s0 = inlined_call_operand.vmem [shape: f32[8,768], index: 0, kind: input, shape index: {}]   ;;  %s4053_s2 = inlined_call_operand.vmem [shape: f32[1,4], index: 2, kind: input, shape index: {}]   ;;  %s4054_s3 = inlined_call_operand.vmem [shape: f32[8,4], index: 3, kind: output, shape index: {}]  }
   0x1   :  { %v35_v0 = vld [vmem:[%s4051_s1 + $0x78] sm:$0xff]  ;;  %v34_v1 = vld [vmem:[%s4051_s1 + $0x70] sm:$0xff]  ;;  %v33_v2 = vld [vmem:[%s4051_s1 + $0x68] sm:$0xff] }
   0x2   :  { %v2219_v3 = vand.u32 4294901760, %v35_v0  ;;  %v2221_v4 = vand.u32 4294901760, %v34_v1  ;;  %v2223_v5 = vand.u32 4294901760, %v33_v2  ;;  %v32_v6 = vld [vmem:[%s4051_s1 + $0x60] sm:$0xff]  ;;  %v31_v7 = vld [vmem:[%s4051_s1 + $0x58] sm:$0xff]  ;;  %v30_v8 = vld [vmem:[%s4051_s1 + $0x50] sm:$0xff] }
   0x3   :  { %v2234_v9 = vand.u32 4294901760, %v32_v6  ;;  %v2236_v10 = vand.u32 4294901760, %v31_v7  ;;  %v2238_v11 = vand.u32 4294901760, %v30_v8  ;;  %v29_v12 = vld [vmem:[%s4051_s1 + $0x48] sm:$0xff]  ;;  %v28_v13 = vld [vmem:[%s4051_s1 + $0x40] sm:$0xff]  ;;  %v27_v21 = vld [vmem:[%s4051_s1 + $0x38] sm:$0xff] }
   0x4   :  { %121 = vmatpush.msra.mxu0 %v2219_v3  ;;  %v2248_v14 = vsub.f32 %v35_v0, %v2219_v3  ;;  %v2251_v15 = vsub.f32 %v34_v1, %v2221_v4  ;;  %317 = vmatpush.msra.mxu3 %v2219_v3  ;;  %v2255_v16 = vsub.f32 %v33_v2, %v2223_v5  ;;  %v2257_v17 = vand.u32 4294901760, %v29_v12  ;;  %v26_v26 = vld [vmem:[%s4051_s1 + $0x30] sm:$0xff]  ;;  %v25_v36 = vld [vmem:[%s4051_s1 + $0x28] sm:$0xff]  ;;  %v24_v42 = vld [vmem:[%s4051_s1 + $0x20] sm:$0xff] }
   0x5   :  { %v2260_v18 = vsub.f32 %v32_v6, %v2234_v9  ;;  %v2263_v19 = vsub.f32 %v31_v7, %v2236_v10  ;;  %v2266_v20 = vsub.f32 %v30_v8, %v2238_v11  ;;  %v2276_v25 = vand.u32 4294901760, %v28_v13  ;;  %v23_v47 = vld [vmem:[%s4051_s1 + $0x18] sm:$0xff]  ;;  %v22_v54 = vld [vmem:[%s4051_s1 + $0x10] sm:$0xff]  ;;  %v21_v61 = vld [vmem:[%s4051_s1 + $0x8] sm:$0xff] }
   0x6   :  { %123 = vmatpush.msra.mxu0 %v2221_v4  ;;  %264 = vmatpush.msra.mxu2 %v2248_v14  ;;  %v163_v22 = vand.u32 4294901760, %v2248_v14  ;;  %v4070_v23 = vand.u32 4294901760, %v2251_v15  ;;  %v4068_v24 = vand.u32 4294901760, %v2255_v16  ;;  %v2285_v29 = vsub.f32 %v29_v12, %v2257_v17  ;;  %v51_v59 = vld [vmem:[%s4051_s1 + $0xf8] sm:$0xff]  ;;  %v20_v2 = vld [vmem:[%s4051_s1] sm:$0xff]  ;;  %v50_v6 = vld [vmem:[%s4051_s1 + $0xf0] sm:$0xff] }
   0x7   :  { %319 = vmatpush.msra.mxu3 %v2221_v4  ;;  %v4067_v27 = vand.u32 4294901760, %v2260_v18  ;;  %v4064_v28 = vand.u32 4294901760, %v2263_v19  ;;  %v2298_v33 = vand.u32 4294901760, %v27_v21  ;;  %v2301_v34 = vand.u32 4294901760, %v26_v26 }
   0x8   :  { %125 = vmatpush.msra.mxu0 %v2223_v5  ;;  %267 = vmatpush.msra.mxu2 %v2251_v15  ;;  %v164_v30 = vsub.f32 %v2248_v14, %v163_v22  ;;  %v170_v31 = vsub.f32 %v2251_v15, %v4070_v23  ;;  %v176_v32 = vsub.f32 %v2255_v16, %v4068_v24  ;;  %v4062_v35 = vand.u32 4294901760, %v2266_v20 }
   0x9   :  { %321 = vmatpush.msra.mxu3 %v2223_v5  ;;  %v182_v39 = vsub.f32 %v2260_v18, %v4067_v27  ;;  %v2313_v40 = vsub.f32 %v28_v13, %v2276_v25  ;;  %v188_v41 = vsub.f32 %v2263_v19, %v4064_v28  ;;  %v2323_v44 = vand.u32 4294901760, %v25_v36 }
   0xa   :  { %127 = vmatpush.msra.mxu0 %v2234_v9  ;;  %v165_v37 = vand.u32 4294901760, %v164_v30  ;;  %270 = vmatpush.msra.mxu2 %v2255_v16  ;;  %v171_v38 = vand.u32 4294901760, %v170_v31  ;;  %v177_v43 = vand.u32 4294901760, %v176_v32  ;;  %v4061_v45 = vand.u32 4294901760, %v2285_v29  ;;  %v49_v32 = vld [vmem:[%s4051_s1 + $0xe8] sm:$0xff] }
   0xb   :  { %323 = vmatpush.msra.mxu3 %v2234_v9  ;;  %v2327_v46 = vsub.f32 %v27_v21, %v2298_v33  ;;  %v194_v48 = vsub.f32 %v2266_v20, %v4062_v35  ;;  %v183_v49 = vand.u32 4294901760, %v182_v39  ;;  %v2338_v50 = vand.u32 4294901760, %v24_v42 }
   0xc   :  { %129 = vmatpush.msra.mxu0 %v2236_v10  ;;  %166 = vmatpush.msra.mxu1 %v165_v37  ;;  %v4060_v51 = vand.u32 4294901760, %v2313_v40  ;;  %v2342_v52 = vsub.f32 %v26_v26, %v2301_v34  ;;  %v2346_v53 = vand.u32 4294901760, %v23_v47  ;;  %v189_v55 = vand.u32 4294901760, %v188_v41 }
   0xd   :  { %273 = vmatpush.msra.mxu2 %v2260_v18  ;;  %325 = vmatpush.msra.mxu3 %v2236_v10  ;;  %v200_v56 = vsub.f32 %v2285_v29, %v4061_v45  ;;  %v4059_v57 = vand.u32 4294901760, %v2327_v46  ;;  %v2357_v58 = vsub.f32 %v25_v36, %v2323_v44  ;;  %v195_v60 = vand.u32 4294901760, %v194_v48  ;;  %v44_v45 = vld [vmem:[%s4051_s1 + $0xc0] sm:$0xff] }
   0xe   :  { %131 = vmatpush.msra.mxu0 %v2238_v11  ;;  %172 = vmatpush.msra.mxu1 %v171_v38  ;;  %v206_v62 = vsub.f32 %v2313_v40, %v4060_v51  ;;  %v2371_v63 = vand.u32 4294901760, %v22_v54  ;;  %v4058_v0 = vand.u32 4294901760, %v2342_v52  ;;  %v2375_v1 = vsub.f32 %v24_v42, %v2338_v50 }
   0xf   :  { %276 = vmatpush.msra.mxu2 %v2263_v19  ;;  %327 = vmatpush.msra.mxu3 %v2238_v11  ;;  %v2386_v7 = vsub.f32 %v23_v47, %v2346_v53  ;;  %v2388_v8 = vand.u32 4294901760, %v51_v59  ;;  %v201_v12 = vand.u32 4294901760, %v200_v56  ;;  %v212_v13 = vsub.f32 %v2327_v46, %v4059_v57 }
  0x10   :  { %133 = vmatpush.msra.mxu0 %v2257_v17  ;;  %178 = vmatpush.msra.mxu1 %v177_v43  ;;  %v2394_v21 = vand.u32 4294901760, %v21_v61  ;;  %v4056_v26 = vand.u32 4294901760, %v2357_v58  ;;  %v2399_v30 = vand.u32 4294901760, %v20_v2  ;;  %v2401_v31 = vand.u32 4294901760, %v50_v6  ;;  %v48_v43 = vld [vmem:[%s4051_s1 + $0xe0] sm:$0xff] }
  0x11   :  { %279 = vmatpush.msra.mxu2 %v2266_v20  ;;  %329 = vmatpush.msra.mxu3 %v2257_v17  ;;  %v207_v36 = vand.u32 4294901760, %v206_v62  ;;  %v218_v37 = vsub.f32 %v2342_v52, %v4058_v0  ;;  %v4055_v38 = vand.u32 4294901760, %v2375_v1  ;;  %v2412_v39 = vsub.f32 %v22_v54, %v2371_v63 }
  0x12   :  { %135 = vmatpush.msra.mxu0 %v2276_v25  ;;  %184 = vmatpush.msra.mxu1 %v183_v49  ;;  %v4057_v41 = vand.u32 4294901760, %v2386_v7  ;;  %v2418_v42 = vsub.f32 %v51_v59, %v2388_v8  ;;  %v213_v47 = vand.u32 4294901760, %v212_v13  ;;  %v224_v48 = vsub.f32 %v2357_v58, %v4056_v26  ;;  %v47_v59 = vld [vmem:[%s4051_s1 + $0xd8] sm:$0xff]  ;;  %v46_v13 = vld [vmem:[%s4051_s1 + $0xd0] sm:$0xff] }
  0x13   :  { %282 = vmatpush.msra.mxu2 %v2285_v29  ;;  %331 = vmatpush.msra.mxu3 %v2276_v25  ;;  %v2428_v49 = vsub.f32 %v21_v61, %v2394_v21  ;;  %v2430_v54 = vand.u32 4294901760, %v49_v32  ;;  %v2438_v56 = vsub.f32 %v50_v6, %v2401_v31  ;;  %v230_v61 = vsub.f32 %v2375_v1, %v4055_v38 }
  0x14   :  { %137 = vmatpush.msra.mxu0 %v2298_v33  ;;  %190 = vmatpush.msra.mxu1 %v189_v55  ;;  %v2435_v55 = vsub.f32 %v20_v2, %v2399_v30  ;;  %v4063_v62 = vand.u32 4294901760, %v2412_v39  ;;  %v236_v2 = vsub.f32 %v2386_v7, %v4057_v41  ;;  %v4065_v6 = vand.u32 4294901760, %v2418_v42 }
  0x15   :  { %285 = vmatpush.msra.mxu2 %v2313_v40  ;;  %333 = vmatpush.msra.mxu3 %v2298_v33  ;;  %v2462_v38 = vsub.f32 %v49_v32, %v2430_v54  ;;  %v2464_v26 = vand.u32 4294901760, %v47_v59  ;;  %v4069_v0 = vand.u32 4294901760, %v2438_v56  ;;  %v2480_v51 = vand.u32 4294901760, %v46_v13 }
  0x16   :  { %139 = vmatpush.msra.mxu0 %v2301_v34  ;;  %196 = vmatpush.msra.mxu1 %v195_v60  ;;  %v219_v60 = vand.u32 4294901760, %v218_v37  ;;  %v4066_v37 = vand.u32 4294901760, %v2428_v49  ;;  %v4071_v41 = vand.u32 4294901760, %v2435_v55  ;;  %v242_v32 = vsub.f32 %v2412_v39, %v4063_v62 }
  0x17   :  { %288 = vmatpush.msra.mxu2 %v2327_v46  ;;  %335 = vmatpush.msra.mxu3 %v2301_v34  ;;  %v237_v35 = vand.u32 4294901760, %v236_v2  ;;  %v2496_v62 = vsub.f32 %v47_v59, %v2464_v26  ;;  %v43_v2 = vld [vmem:[%s4051_s1 + $0xb8] sm:$0xff]  ;;  %v2516_v24 = vsub.f32 %v46_v13, %v2480_v51 }
  0x18   :  { %141 = vmatpush.msra.mxu0 %v2323_v44  ;;  %202 = vmatpush.msra.mxu1 %v201_v12  ;;  %v2448_v12 = vand.u32 4294901760, %v48_v43  ;;  %v243_v59 = vand.u32 4294901760, %v242_v32  ;;  %v2521_v23 = vand.u32 4294901760, %v43_v2 }
  0x19   :  { %291 = vmatpush.msra.mxu2 %v2342_v52  ;;  %337 = vmatpush.msra.mxu3 %v2323_v44  ;;  %v4074_v14 = vand.u32 4294901760, %v2496_v62 }
  0x1a   :  { %143 = vmatpush.msra.mxu0 %v2338_v50  ;;  %208 = vmatpush.msra.mxu1 %v207_v36  ;;  %v225_v36 = vand.u32 4294901760, %v224_v48  ;;  %v231_v48 = vand.u32 4294901760, %v230_v61  ;;  %v2478_v57 = vsub.f32 %v48_v43, %v2448_v12  ;;  %v248_v43 = vsub.f32 %v2428_v49, %v4066_v37 }
  0x1b   :  { %294 = vmatpush.msra.mxu2 %v2357_v58  ;;  %339 = vmatpush.msra.mxu3 %v2338_v50  ;;  %v4072_v61 = vand.u32 4294901760, %v2462_v38  ;;  %v254_v37 = vsub.f32 %v2435_v55, %v4071_v41 }
  0x1c   :  { %145 = vmatpush.msra.mxu0 %v2346_v53  ;;  %214 = vmatpush.msra.mxu1 %v213_v47  ;;  %v45_v47 = vld [vmem:[%s4051_s1 + $0xc8] sm:$0xff]  ;;  %v4073_v27 = vand.u32 4294901760, %v2478_v57  ;;  %v249_v32 = vand.u32 4294901760, %v248_v43 }
  0x1d   :  { %297 = vmatpush.msra.mxu2 %v2375_v1  ;;  %341 = vmatpush.msra.mxu3 %v2346_v53  ;;  %v2498_v28 = vand.u32 4294901760, %v45_v47  ;;  %v517_v13 = vsub.f32 %v2462_v38, %v4072_v61  ;;  %v41_v43 = vld [vmem:[%s4051_s1 + $0xa8] sm:$0xff]  ;;  %v255_v61 = vand.u32 4294901760, %v254_v37 }
  0x1e   :  { %147 = vmatpush.msra.mxu0 %v2371_v63  ;;  %220 = vmatpush.msra.mxu1 %v219_v60  ;;  %v505_v60 = vsub.f32 %v2418_v42, %v4065_v6  ;;  %v2508_v6 = vand.u32 4294901760, %v44_v45 }
  0x1f   :  { %300 = vmatpush.msra.mxu2 %v2386_v7  ;;  %343 = vmatpush.msra.mxu3 %v2371_v63  ;;  %v518_v37 = vand.u32 4294901760, %v517_v13 }
  0x20   :  { %149 = vmatpush.msra.mxu0 %v2394_v21  ;;  %226 = vmatpush.msra.mxu1 %v225_v36  ;;  %v511_v36 = vsub.f32 %v2438_v56, %v4069_v0  ;;  %v506_v0 = vand.u32 4294901760, %v505_v60  ;;  %v4121_v60 = vand.u32 4294901760, %v2251_v15 }
  0x21   :  { %303 = vmatpush.msra.mxu2 %v2412_v39  ;;  %345 = vmatpush.msra.mxu3 %v2394_v21 }
  0x22   :  { %151 = vmatpush.msra.mxu0 %v2399_v30  ;;  %232 = vmatpush.msra.mxu1 %v231_v48  ;;  %v42_v48 = vld [vmem:[%s4051_s1 + $0xb0] sm:$0xff]  ;;  %v512_v41 = vand.u32 4294901760, %v511_v36  ;;  %v4122_v36 = vand.u32 4294901760, %v2255_v16  ;;  %v2563_v16 = vand.u32 4294901760, %v41_v43 }
  0x23   :  { %306 = vmatpush.msra.mxu2 %v2428_v49  ;;  %347 = vmatpush.msra.mxu3 %v2399_v30 }
  0x24   :  { %358 = vmatpush.msrb.mxu0 %v163_v22  ;;  %238 = vmatpush.msra.mxu1 %v237_v35  ;;  %v2532_v22 = vsub.f32 %v45_v47, %v2498_v28  ;;  %v2538_v35 = vsub.f32 %v44_v45, %v2508_v6  ;;  %v523_v47 = vsub.f32 %v2478_v57, %v4073_v27 }
  0x25   :  { %309 = vmatpush.msra.mxu2 %v2435_v55  ;;  %507 = vmatpush.msrb.mxu3 %v506_v0  ;;  %v2553_v45 = vsub.f32 %v43_v2, %v2521_v23  ;;  %v529_v27 = vsub.f32 %v2496_v62, %v4074_v14  ;;  %v4123_v0 = vand.u32 4294901760, %v2260_v18  ;;  %v2592_v2 = vsub.f32 %v41_v43, %v2563_v16 }
  0x26   :  { %362 = vmatpush.msrb.mxu0 %v4121_v60  ;;  %244 = vmatpush.msra.mxu1 %v243_v59  ;;  %v2548_v60 = vand.u32 4294901760, %v42_v48  ;;  %v40_v59 = vld [vmem:[%s4051_s1 + $0xa0] sm:$0xff]  ;;  %v524_v13 = vand.u32 4294901760, %v523_v47 }
  0x27   :  { %462 = vmatpush.msrb.mxu2 %v2388_v8  ;;  %513 = vmatpush.msrb.mxu3 %v512_v41  ;;  %v2578_v18 = vand.u32 4294901760, %v40_v59  ;;  %v4125_v41 = vand.u32 4294901760, %v2263_v19  ;;  %v530_v47 = vand.u32 4294901760, %v529_v27  ;;  %v38_v27 = vld [vmem:[%s4051_s1 + $0x90] sm:$0xff] }
  0x28   :  { %366 = vmatpush.msrb.mxu0 %v4122_v36  ;;  %250 = vmatpush.msra.mxu1 %v249_v32  ;;  %v39_v32 = vld [vmem:[%s4051_s1 + $0x98] sm:$0xff]  ;;  %v4124_v36 = vand.u32 4294901760, %v2516_v24  ;;  %v2576_v15 = vsub.f32 %v42_v48, %v2548_v60  ;;  %v4126_v48 = vand.u32 4294901760, %v2532_v22 }
  0x29   :  { %464 = vmatpush.msrb.mxu2 %v2401_v31  ;;  %519 = vmatpush.msrb.mxu3 %v518_v37  ;;  %v2594_v19 = vand.u32 4294901760, %v39_v32  ;;  %v2623_v37 = vand.u32 4294901760, %v38_v27 }
  0x2a   :  { %370 = vmatpush.msrb.mxu0 %v4123_v0  ;;  %256 = vmatpush.msra.mxu1 %v255_v61  ;;  %v535_v14 = vsub.f32 %v2516_v24, %v4124_v36  ;;  %v14_v61 = vld [vmem:[%s4052_s0] sm:$0xff]  ;;  %v541_v36 = vsub.f32 %v2532_v22, %v4126_v48  ;;  %v2608_v48 = vsub.f32 %v40_v59, %v2578_v18 }
  0x2b   :  { %466 = vmatpush.msrb.mxu2 %v2430_v54  ;;  %525 = vmatpush.msrb.mxu3 %v524_v13 }
  0x2c   :  { %374 = vmatpush.msrb.mxu0 %v4125_v41  ;;  %425 = vmatpush.msrb.mxu1 %v2219_v3  ;;  %v4127_v3 = vand.u32 4294901760, %v2266_v20  ;;  %v4128_v41 = vand.u32 4294901760, %v2538_v35  ;;  %v536_v43 = vand.u32 4294901760, %v535_v14  ;;  %v2610_v20 = vand.u32 4294901760, %v14_v61  ;;  %v37_v14 = vld [vmem:[%s4051_s1 + $0x88] sm:$0xff] }
  0x2d   :  { %468 = vmatpush.msrb.mxu2 %v2448_v12  ;;  %531 = vmatpush.msrb.mxu3 %v530_v47  ;;  %v542_v59 = vand.u32 4294901760, %v541_v36  ;;  %v4132_v47 = vand.u32 4294901760, %v2576_v15 }
  0x2e   :  { %378 = vmatpush.msrb.mxu0 %v4127_v3  ;;  %427 = vmatpush.msrb.mxu1 %v2221_v4  ;;  %v547_v0 = vsub.f32 %v2538_v35, %v4128_v41  ;;  %v4129_v4 = vand.u32 4294901760, %v2285_v29  ;;  %v4130_v3 = vand.u32 4294901760, %v2553_v45  ;;  %v2626_v29 = vsub.f32 %v39_v32, %v2594_v19 }
  0x2f   :  { %470 = vmatpush.msrb.mxu2 %v2464_v26  ;;  %537 = vmatpush.msrb.mxu3 %v536_v43  ;;  %v559_v36 = vsub.f32 %v2576_v15, %v4132_v47  ;;  %v2640_v13 = vsub.f32 %v14_v61, %v2610_v20  ;;  %v4134_v43 = vand.u32 4294901760, %v2592_v2  ;;  %v2653_v61 = vsub.f32 %v38_v27, %v2623_v37 }
  0x30   :  { %382 = vmatpush.msrb.mxu0 %v4129_v4  ;;  %429 = vmatpush.msrb.mxu1 %v2223_v5  ;;  %v553_v41 = vsub.f32 %v2553_v45, %v4130_v3  ;;  %v4131_v5 = vand.u32 4294901760, %v2313_v40  ;;  %v548_v4 = vand.u32 4294901760, %v547_v0  ;;  %v36_v3 = vld [vmem:[%s4051_s1 + $0x80] sm:$0xff]  ;;  %v2642_v40 = vand.u32 4294901760, %v37_v14 }
  0x31   :  { %472 = vmatpush.msrb.mxu2 %v2480_v51  ;;  %543 = vmatpush.msrb.mxu3 %v542_v59  ;;  %v576_v47 = vand.u32 4294901760, %v2626_v29  ;;  %v2655_v32 = vand.u32 4294901760, %v36_v3 }
  0x32   :  { %386 = vmatpush.msrb.mxu0 %v4131_v5  ;;  %431 = vmatpush.msrb.mxu1 %v2234_v9  ;;  %v4133_v9 = vand.u32 4294901760, %v2327_v46  ;;  %v554_v0 = vand.u32 4294901760, %v553_v41  ;;  %v565_v5 = vsub.f32 %v2592_v2, %v4134_v43  ;;  %v4135_v46 = vand.u32 4294901760, %v2342_v52 }
  0x33   :  { %474 = vmatpush.msrb.mxu2 %v2498_v28  ;;  %549 = vmatpush.msrb.mxu3 %v548_v4  ;;  %v4136_v41 = vand.u32 4294901760, %v2608_v48  ;;  %v2666_v27 = vsub.f32 %v37_v14, %v2642_v40  ;;  %v4137_v43 = vand.u32 4294901760, %v2357_v58  ;;  %v577_v52 = vsub.f32 %v2626_v29, %v576_v47 }
  0x34   :  { %390 = vmatpush.msrb.mxu0 %v4133_v9  ;;  %433 = vmatpush.msrb.mxu1 %v2236_v10  ;;  %v560_v10 = vand.u32 4294901760, %v559_v36  ;;  %v154_v9 = vand.u32 4294901760, %v2640_v13  ;;  %v582_v4 = vand.u32 4294901760, %v2653_v61  ;;  %v2677_v36 = vsub.f32 %v36_v3, %v2655_v32 }
  0x35   :  { %476 = vmatpush.msrb.mxu2 %v2508_v6  ;;  %v571_v59 = vsub.f32 %v2608_v48, %v4136_v41  ;;  %555 = vmatpush.msrb.mxu3 %v554_v0  ;;  %v4138_v14 = vand.u32 4294901760, %v2375_v1  ;;  %v4139_v3 = vand.u32 4294901760, %v2386_v7  ;;  %v4140_v41 = vand.u32 4294901760, %v2412_v39 }
  0x36   :  { %394 = vmatpush.msrb.mxu0 %v4135_v46  ;;  %435 = vmatpush.msrb.mxu1 %v2238_v11  ;;  %v566_v11 = vand.u32 4294901760, %v565_v5  ;;  %v155_v0 = vsub.f32 %v2640_v13, %v154_v9  ;;  %v588_v5 = vand.u32 4294901760, %v2666_v27  ;;  %v583_v1 = vsub.f32 %v2653_v61, %v582_v4 }
  0x37   :  { %478 = vmatpush.msrb.mxu2 %v2521_v23  ;;  %561 = vmatpush.msrb.mxu3 %v560_v10  ;;  %v572_v58 = vand.u32 4294901760, %v571_v59  ;;  %v594_v46 = vand.u32 4294901760, %v2677_v36  ;;  %v4141_v59 = vand.u32 4294901760, %v2428_v49 }
  0x38   :  { %398 = vmatpush.msrb.mxu0 %v4137_v43  ;;  %437 = vmatpush.msrb.mxu1 %v2257_v17  ;;  %v15_v17 = vld [vmem:[%s4052_s0 + $0x8] sm:$0xff]  ;;  %v589_v7 = vsub.f32 %v2666_v27, %v588_v5  ;;  %v584_v39 = vand.u32 4294901760, %v583_v1 }
  0x39   :  { %480 = vmatpush.msrb.mxu2 %v2548_v60  ;;  %567 = vmatpush.msrb.mxu3 %v566_v11  ;;  %v2696_v10 = vand.u32 4294901760, %v15_v17  ;;  %v4142_v11 = vand.u32 4294901760, %v2435_v55  ;;  %v4146_v55 = vand.u32 4294901760, %v2478_v57 }
  0x3a   :  { %402 = vmatpush.msrb.mxu0 %v4138_v14  ;;  %439 = vmatpush.msrb.mxu1 %v2276_v25  ;;  %v578_v25 = vand.u32 4294901760, %v577_v52 }
  0x3b   :  { %482 = vmatpush.msrb.mxu2 %v2563_v16  ;;  %573 = vmatpush.msrb.mxu3 %v572_v58  ;;  %v2713_v43 = vsub.f32 %v15_v17, %v2696_v10 }
  0x3c   :  { %406 = vmatpush.msrb.mxu0 %v4139_v3  ;;  %441 = vmatpush.msrb.mxu1 %v2298_v33  ;;  %v156_v33 = vand.u32 4294901760, %v155_v0  ;;  %v58_v0 = vld [vmem:[%s4051_s1 + $0x130] sm:$0xff] }
  0x3d   :  { %484 = vmatpush.msrb.mxu2 %v2578_v18  ;;  %579 = vmatpush.msrb.mxu3 %v578_v25  ;;  %v495_v52 = vand.u32 4294901760, %v2713_v43 }
  0x3e   :  { %410 = vmatpush.msrb.mxu0 %v4140_v41  ;;  %443 = vmatpush.msrb.mxu1 %v2301_v34  ;;  %v595_v34 = vsub.f32 %v2677_v36, %v594_v46 }
  0x3f   :  { %486 = vmatpush.msrb.mxu2 %v2594_v19  ;;  %157 = vmatmul.f32.vlgmr.msra.gmra.mxu0 %v156_v33  ;;  %v2914_v33 = vand.u32 4294901760, %v58_v0 }
  0x40   :  { %414 = vmatpush.msrb.mxu0 %v4141_v59  ;;  %445 = vmatpush.msrb.mxu1 %v2323_v44  ;;  %v590_v44 = vand.u32 4294901760, %v589_v7  ;;  %v596_v49 = vand.u32 4294901760, %v595_v34  ;;  %v56_v59 = vld [vmem:[%s4051_s1 + $0x120] sm:$0xff] }
  0x41   :  { %488 = vmatpush.msrb.mxu2 %v2623_v37  ;;  %585 = vmatpush.msrb.mxu3 %v584_v39 }
  0x42   :  { %418 = vmatpush.msrb.mxu0 %v4142_v11  ;;  %447 = vmatpush.msrb.mxu1 %v2338_v50  ;;  %v4143_v50 = vand.u32 4294901760, %v2418_v42 }
  0x43   :  { %490 = vmatpush.msrb.mxu2 %v2642_v40  ;;  %591 = vmatpush.msrb.mxu3 %v590_v44  ;;  %v16_v44 = vld [vmem:[%s4052_s0 + $0x10] sm:$0xff] }
  0x44   :  { %605 = vmatpush.msra.mxu0 %v2418_v42  ;;  %449 = vmatpush.msrb.mxu1 %v2346_v53  ;;  %v496_v53 = vsub.f32 %v2713_v43, %v495_v52 }
  0x45   :  { %492 = vmatpush.msrb.mxu2 %v2655_v32  ;;  %597 = vmatpush.msrb.mxu3 %v596_v49 }
  0x46   :  { %608 = vmatpush.msra.mxu0 %v2438_v56  ;;  %451 = vmatpush.msrb.mxu1 %v2371_v63  ;;  %v4144_v63 = vand.u32 4294901760, %v2438_v56  ;;  %v497_v42 = vand.u32 4294901760, %v496_v53  ;;  %v4153_v56 = vand.u32 4294901760, %v2592_v2  ;;  %v2947_v53 = vand.u32 4294901760, %v56_v59 }
  0x47   :  { %312 = vmatmul.f32.vlgmr.msra.gmra.mxu2 %v2640_v13  ;;  %351 = vmatmul.f32.vlgmr.msra.gmra.mxu3 %v154_v9 }
  0x48   :  { %611 = vmatpush.msra.mxu0 %v2462_v38  ;;  %699 = vmatpush.msra.mxu2 %v4143_v50 }
  0x49   :  { %453 = vmatpush.msrb.mxu1 %v2394_v21  ;;  %766 = vmatpush.msra.mxu3 %v2388_v8  ;;  %v4145_v21 = vand.u32 4294901760, %v2462_v38  ;;  %v4152_v38 = vand.u32 4294901760, %v2576_v15 }
  0x4a   :  { %614 = vmatpush.msra.mxu0 %v2478_v57  ;;  %703 = vmatpush.msra.mxu2 %v4144_v63  ;;  %v4148_v57 = vand.u32 4294901760, %v2516_v24 }
  0x4b   :  { %455 = vmatpush.msrb.mxu1 %v2399_v30  ;;  %768 = vmatpush.msra.mxu3 %v2401_v31  ;;  %v4147_v30 = vand.u32 4294901760, %v2496_v62 }
  0x4c   :  { %617 = vmatpush.msra.mxu0 %v2496_v62  ;;  %258 = vmatmul.f32.vlgmr.msra.gmra.mxu1 %v2610_v20 }
  0x4d   :  { %707 = vmatpush.msra.mxu2 %v4145_v21  ;;  %658 = vmatpush.msra.mxu1 %v2388_v8  ;;  %v4149_v8 = vand.u32 4294901760, %v2532_v22  ;;  %v2951_v21 = vsub.f32 %v58_v0, %v2914_v33 }
  0x4e   :  { %620 = vmatpush.msra.mxu0 %v2516_v24  ;;  %770 = vmatpush.msra.mxu3 %v2430_v54  ;;  %v4150_v24 = vand.u32 4294901760, %v2538_v35 }
  0x4f   :  { %711 = vmatpush.msra.mxu2 %v4146_v55  ;;  %660 = vmatpush.msra.mxu1 %v2401_v31  ;;  %v4151_v31 = vand.u32 4294901760, %v2553_v45  ;;  %v54_v55 = vld [vmem:[%s4051_s1 + $0x110] sm:$0xff] }
  0x50   :  { %498 = vmatmul.f32.vlgmr.msrb.gmra.mxu2 %v497_v42  ;;  %623 = vmatpush.msra.mxu0 %v2532_v22 }
  0x51   :  { %662 = vmatpush.msra.mxu1 %v2430_v54  ;;  %715 = vmatpush.msra.mxu2 %v4147_v30  ;;  %v65_v54 = vld [vmem:[%s4051_s1 + $0x168] sm:$0xff]  ;;  %v2958_v30 = vand.u32 4294901760, %v16_v44 }
  0x52   :  { %772 = vmatpush.msra.mxu3 %v2448_v12  ;;  %420 = vmatmul.f32.vlgmr.msrb.gmra.mxu0 %v2610_v20 }
  0x53   :  { %599 = vmatmul.f32.vlgmr.msrb.gmra.mxu3 %v2696_v10  ;;  %626 = vmatpush.msra.mxu0 %v2538_v35  ;;  %v63_v35 = vld [vmem:[%s4051_s1 + $0x158] sm:$0xff] }
  0x54   :  { %664 = vmatpush.msra.mxu1 %v2448_v12  ;;  %719 = vmatpush.msra.mxu2 %v4148_v57  ;;  %v64_v12 = vld [vmem:[%s4051_s1 + $0x160] sm:$0xff] }
  0x55   :  { %774 = vmatpush.msra.mxu3 %v2464_v26  ;;  %457 = vmatmul.f32.vlgmr.msrb.gmra.mxu1 %v2610_v20 }
  0x56   :  { %629 = vmatpush.msra.mxu0 %v2553_v45  ;;  %666 = vmatpush.msra.mxu1 %v2464_v26  ;;  %v67_v26 = vld [vmem:[%s4051_s1 + $0x178] sm:$0xff]  ;;  %v62_v45 = vld [vmem:[%s4051_s1 + $0x150] sm:$0xff] }
  0x57   :  { %723 = vmatpush.msra.mxu2 %v4149_v8  ;;  %776 = vmatpush.msra.mxu3 %v2480_v51  ;;  %v2842_v20 = vand.u32 4294901760, %v62_v45 }
  0x58   :  { %632 = vmatpush.msra.mxu0 %v2576_v15  ;;  %668 = vmatpush.msra.mxu1 %v2480_v51  ;;  %v66_v51 = vld [vmem:[%s4051_s1 + $0x170] sm:$0xff]  ;;  %v2821_v15 = vand.u32 4294901760, %v64_v12 }
  0x59   :  { %727 = vmatpush.msra.mxu2 %v4150_v24  ;;  %778 = vmatpush.msra.mxu3 %v2498_v28  ;;  %v2798_v62 = vand.u32 4294901760, %v66_v51 }
  0x5a   :  { %635 = vmatpush.msra.mxu0 %v2592_v2  ;;  %670 = vmatpush.msra.mxu1 %v2498_v28  ;;  %v2788_v28 = vand.u32 4294901760, %v67_v26  ;;  %v2831_v2 = vand.u32 4294901760, %v63_v35 }
  0x5b   :  { %731 = vmatpush.msra.mxu2 %v4151_v31  ;;  %780 = vmatpush.msra.mxu3 %v2508_v6 }
  0x5c   :  { %638 = vmatpush.msra.mxu0 %v2608_v48  ;;  %672 = vmatpush.msra.mxu1 %v2508_v6  ;;  %v2808_v6 = vand.u32 4294901760, %v65_v54  ;;  %v2811_v22 = vsub.f32 %v67_v26, %v2788_v28 }
  0x5d   :  { %735 = vmatpush.msra.mxu2 %v4152_v38  ;;  %782 = vmatpush.msra.mxu3 %v2521_v23  ;;  %v2976_v38 = vand.u32 4294901760, %v54_v55 }
  0x5e   :  { %641 = vmatpush.msra.mxu0 %v2626_v29  ;;  %674 = vmatpush.msra.mxu1 %v2521_v23  ;;  %v4154_v23 = vand.u32 4294901760, %v2608_v48  ;;  %v2838_v48 = vsub.f32 %v65_v54, %v2808_v6  ;;  %v2852_v29 = vsub.f32 %v64_v12, %v2821_v15  ;;  %v4078_v54 = vand.u32 4294901760, %v2951_v21  ;;  %v53_v12 = vld [vmem:[%s4051_s1 + $0x108] sm:$0xff] }
  0x5f   :  { %739 = vmatpush.msra.mxu2 %v4153_v56  ;;  %784 = vmatpush.msra.mxu3 %v2548_v60  ;;  %v2980_v56 = vsub.f32 %v56_v59, %v2947_v53 }
  0x60   :  { %644 = vmatpush.msra.mxu0 %v2653_v61  ;;  %676 = vmatpush.msra.mxu1 %v2548_v60  ;;  %v2824_v60 = vsub.f32 %v66_v51, %v2798_v62  ;;  %v4088_v17 = vand.u32 4294901760, %v2852_v29 }
  0x61   :  { %743 = vmatpush.msra.mxu2 %v4154_v23  ;;  %786 = vmatpush.msra.mxu3 %v2563_v16  ;;  %v2988_v23 = vsub.f32 %v16_v44, %v2958_v30 }
  0x62   :  { %647 = vmatpush.msra.mxu0 %v2666_v27  ;;  %678 = vmatpush.msra.mxu1 %v2563_v16  ;;  %v845_v16 = vand.u32 4294901760, %v2811_v22  ;;  %v851_v13 = vand.u32 4294901760, %v2824_v60  ;;  %v2874_v27 = vsub.f32 %v62_v45, %v2842_v20  ;;  %v864_v41 = vsub.f32 %v2852_v29, %v4088_v17 }
  0x63   :  { %747 = vmatpush.msra.mxu2 %v576_v47  ;;  %788 = vmatpush.msra.mxu3 %v2578_v18  ;;  %v60_v47 = vld [vmem:[%s4051_s1 + $0x140] sm:$0xff] }
  0x64   :  { %650 = vmatpush.msra.mxu0 %v2677_v36  ;;  %680 = vmatpush.msra.mxu1 %v2578_v18  ;;  %v61_v18 = vld [vmem:[%s4051_s1 + $0x148] sm:$0xff]  ;;  %v846_v61 = vsub.f32 %v2811_v22, %v845_v16  ;;  %v852_v36 = vsub.f32 %v2824_v60, %v851_v13  ;;  %v2884_v14 = vand.u32 4294901760, %v60_v47  ;;  %v4083_v1 = vand.u32 4294901760, %v2874_v27 }
  0x65   :  { %751 = vmatpush.msra.mxu2 %v582_v4  ;;  %790 = vmatpush.msra.mxu3 %v2594_v19  ;;  %v2868_v9 = vand.u32 4294901760, %v61_v18  ;;  %v59_v4 = vld [vmem:[%s4051_s1 + $0x138] sm:$0xff]  ;;  %v865_v50 = vand.u32 4294901760, %v864_v41 }
  0x66   :  { %653 = vmatmul.f32.vlgmr.msra.gmra.mxu0 %v2713_v43  ;;  %682 = vmatpush.msra.mxu1 %v2594_v19  ;;  %v2857_v19 = vsub.f32 %v63_v35, %v2831_v2  ;;  %v2898_v25 = vand.u32 4294901760, %v59_v4  ;;  %v2917_v7 = vsub.f32 %v60_v47, %v2884_v14  ;;  %v876_v49 = vsub.f32 %v2874_v27, %v4083_v1 }
  0x67   :  { %803 = vmatpush.msrb.mxu0 %v2788_v28  ;;  %755 = vmatpush.msra.mxu2 %v588_v5  ;;  %v847_v5 = vand.u32 4294901760, %v846_v61  ;;  %v83_v61 = vld [vmem:[%s4051_s1 + $0x1f8] sm:$0xff] }
  0x68   :  { %792 = vmatpush.msra.mxu3 %v2623_v37  ;;  %684 = vmatpush.msra.mxu1 %v2623_v37  ;;  %v857_v37 = vand.u32 4294901760, %v2838_v48  ;;  %v4085_v58 = vand.u32 4294901760, %v2857_v19  ;;  %v2933_v43 = vsub.f32 %v59_v4, %v2898_v25  ;;  %v4080_v63 = vand.u32 4294901760, %v2917_v7 }
  0x69   :  { %805 = vmatpush.msrb.mxu0 %v2798_v62  ;;  %759 = vmatpush.msra.mxu2 %v594_v46  ;;  %v57_v46 = vld [vmem:[%s4051_s1 + $0x128] sm:$0xff]  ;;  %v877_v31 = vand.u32 4294901760, %v876_v49  ;;  %v3003_v4 = vand.u32 4294901760, %v53_v12  ;;  %v3019_v41 = vand.u32 4294901760, %v83_v61 }
  0x6a   :  { %794 = vmatpush.msra.mxu3 %v2642_v40  ;;  %761 = vmatmul.f32.vlgmr.msra.gmra.mxu2 %v2696_v10  ;;  %v858_v3 = vsub.f32 %v2838_v48, %v857_v37  ;;  %v2929_v34 = vand.u32 4294901760, %v57_v46  ;;  %v4079_v24 = vand.u32 4294901760, %v2933_v43  ;;  %v888_v51 = vsub.f32 %v2917_v7, %v4080_v63 }
  0x6b   :  { %807 = vmatpush.msrb.mxu0 %v2808_v6  ;;  %946 = vmatpush.msrb.mxu2 %v2811_v22  ;;  %v75_v22 = vld [vmem:[%s4051_s1 + $0x1b8] sm:$0xff] }
  0x6c   :  { %686 = vmatpush.msra.mxu1 %v2642_v40  ;;  %796 = vmatpush.msra.mxu3 %v2655_v32  ;;  %v2901_v40 = vsub.f32 %v61_v18, %v2868_v9  ;;  %v859_v39 = vand.u32 4294901760, %v858_v3  ;;  %v2968_v26 = vsub.f32 %v57_v46, %v2929_v34  ;;  %v894_v45 = vsub.f32 %v2933_v43, %v4079_v24 }
  0x6d   :  { %798 = vmatmul.f32.vlgmr.msra.gmra.mxu3 %v2696_v10  ;;  %809 = vmatpush.msrb.mxu0 %v2821_v15  ;;  %v853_v10 = vand.u32 4294901760, %v852_v36  ;;  %v52_v36 = vld [vmem:[%s4051_s1 + $0x100] sm:$0xff]  ;;  %v889_v0 = vand.u32 4294901760, %v888_v51  ;;  %v4075_v3 = vand.u32 4294901760, %v2980_v56  ;;  %v3014_v46 = vsub.f32 %v54_v55, %v2976_v38 }
  0x6e   :  { %949 = vmatpush.msrb.mxu2 %v2824_v60  ;;  %999 = vmatpush.msrb.mxu3 %v2788_v28  ;;  %v4082_v11 = vand.u32 4294901760, %v2901_v40  ;;  %v4076_v18 = vand.u32 4294901760, %v2968_v26  ;;  %v895_v59 = vand.u32 4294901760, %v894_v45  ;;  %v3028_v44 = vand.u32 4294901760, %v52_v36  ;;  %v80_v51 = vld [vmem:[%s4051_s1 + $0x1e0] sm:$0xff]  ;;  %v74_v60 = vld [vmem:[%s4051_s1 + $0x1b0] sm:$0xff] }
  0x6f   :  { %688 = vmatpush.msra.mxu1 %v2655_v32  ;;  %811 = vmatpush.msrb.mxu0 %v2831_v2  ;;  %v870_v32 = vsub.f32 %v2857_v19, %v4085_v58  ;;  %v912_v55 = vsub.f32 %v2980_v56, %v4075_v3 }
  0x70   :  { %692 = vmatmul.f32.vlgmr.msra.gmra.mxu1 %v495_v52  ;;  %952 = vmatpush.msrb.mxu2 %v2838_v48  ;;  %v55_v52 = vld [vmem:[%s4051_s1 + $0x118] sm:$0xff]  ;;  %v882_v57 = vsub.f32 %v2901_v40, %v4082_v11 }
  0x71   :  { %848 = vmatpush.msrb.mxu1 %v847_v5  ;;  %1001 = vmatpush.msrb.mxu3 %v2798_v62  ;;  %v871_v42 = vand.u32 4294901760, %v870_v32  ;;  %v2964_v8 = vand.u32 4294901760, %v55_v52  ;;  %v900_v5 = vsub.f32 %v2951_v21, %v4078_v54  ;;  %v82_v32 = vld [vmem:[%s4051_s1 + $0x1f0] sm:$0xff] }
  0x72   :  { %813 = vmatpush.msrb.mxu0 %v2842_v20  ;;  %955 = vmatpush.msrb.mxu2 %v2852_v29  ;;  %v883_v35 = vand.u32 4294901760, %v882_v57  ;;  %v4081_v57 = vand.u32 4294901760, %v3014_v46 }
  0x73   :  { %854 = vmatpush.msrb.mxu1 %v853_v10  ;;  %1003 = vmatpush.msrb.mxu3 %v2808_v6  ;;  %v2996_v47 = vsub.f32 %v55_v52, %v2964_v8  ;;  %v836_v10 = vand.u32 4294901760, %v2988_v23  ;;  %v3034_v52 = vsub.f32 %v53_v12, %v3003_v4 }
  0x74   :  { %815 = vmatpush.msrb.mxu0 %v2868_v9  ;;  %958 = vmatpush.msrb.mxu2 %v2857_v19 }
  0x75   :  { %860 = vmatpush.msrb.mxu1 %v859_v39  ;;  %1005 = vmatpush.msrb.mxu3 %v2821_v15  ;;  %v906_v39 = vsub.f32 %v2968_v26, %v4076_v18  ;;  %v4077_v49 = vand.u32 4294901760, %v2996_v47  ;;  %v837_v12 = vsub.f32 %v2988_v23, %v836_v10  ;;  %v79_v18 = vld [vmem:[%s4051_s1 + $0x1d8] sm:$0xff] }
  0x76   :  { %817 = vmatpush.msrb.mxu0 %v2884_v14  ;;  %961 = vmatpush.msrb.mxu2 %v2874_v27  ;;  %v3084_v63 = vand.u32 4294901760, %v79_v18 }
  0x77   :  { %866 = vmatpush.msrb.mxu1 %v865_v50  ;;  %1007 = vmatpush.msrb.mxu3 %v2831_v2  ;;  %v81_v50 = vld [vmem:[%s4051_s1 + $0x1e8] sm:$0xff]  ;;  %v907_v45 = vand.u32 4294901760, %v906_v39  ;;  %v913_v39 = vand.u32 4294901760, %v912_v55  ;;  %v838_v54 = vand.u32 4294901760, %v837_v12 }
  0x78   :  { %819 = vmatpush.msrb.mxu0 %v2898_v25  ;;  %964 = vmatpush.msrb.mxu2 %v2901_v40  ;;  %v3064_v3 = vand.u32 4294901760, %v81_v50 }
  0x79   :  { %872 = vmatpush.msrb.mxu1 %v871_v42  ;;  %1009 = vmatpush.msrb.mxu3 %v2842_v20  ;;  %v901_v42 = vand.u32 4294901760, %v900_v5  ;;  %v3062_v5 = vsub.f32 %v52_v36, %v3028_v44  ;;  %v924_v36 = vsub.f32 %v3014_v46, %v4081_v57 }
  0x7a   :  { %821 = vmatpush.msrb.mxu0 %v2914_v33  ;;  %967 = vmatpush.msrb.mxu2 %v2917_v7  ;;  %v3092_v57 = vsub.f32 %v81_v50, %v3064_v3 }
  0x7b   :  { %878 = vmatpush.msrb.mxu1 %v877_v31  ;;  %1011 = vmatpush.msrb.mxu3 %v2868_v9  ;;  %v3044_v31 = vand.u32 4294901760, %v82_v32  ;;  %v925_v50 = vand.u32 4294901760, %v924_v36 }
  0x7c   :  { %823 = vmatpush.msrb.mxu0 %v2929_v34  ;;  %970 = vmatpush.msrb.mxu2 %v2933_v43  ;;  %v4089_v36 = vand.u32 4294901760, %v3092_v57 }
  0x7d   :  { %884 = vmatpush.msrb.mxu1 %v883_v35  ;;  %1013 = vmatpush.msrb.mxu3 %v2884_v14  ;;  %v3055_v35 = vsub.f32 %v83_v61, %v3019_v41  ;;  %v4084_v61 = vand.u32 4294901760, %v3034_v52 }
  0x7e   :  { %825 = vmatpush.msrb.mxu0 %v2947_v53  ;;  %973 = vmatpush.msrb.mxu2 %v2951_v21 }
  0x7f   :  { %890 = vmatpush.msrb.mxu1 %v889_v0  ;;  %1015 = vmatpush.msrb.mxu3 %v2898_v25  ;;  %v918_v0 = vsub.f32 %v2996_v47, %v4077_v49  ;;  %v3079_v49 = vsub.f32 %v82_v32, %v3044_v31  ;;  %v4086_v24 = vand.u32 4294901760, %v3055_v35  ;;  %v4087_v32 = vand.u32 4294901760, %v3062_v5 }
  0x80   :  { %827 = vmatpush.msrb.mxu0 %v2964_v8  ;;  %976 = vmatpush.msrb.mxu2 %v2968_v26  ;;  %v930_v12 = vsub.f32 %v3034_v52, %v4084_v61  ;;  %v3114_v61 = vsub.f32 %v79_v18, %v3084_v63 }
  0x81   :  { %896 = vmatpush.msrb.mxu1 %v895_v59  ;;  %1017 = vmatpush.msrb.mxu3 %v2914_v33  ;;  %v3072_v59 = vand.u32 4294901760, %v80_v51  ;;  %v919_v55 = vand.u32 4294901760, %v918_v0  ;;  %v4090_v0 = vand.u32 4294901760, %v3079_v49 }
  0x82   :  { %829 = vmatpush.msrb.mxu0 %v2976_v38  ;;  %979 = vmatpush.msrb.mxu2 %v2980_v56  ;;  %v931_v18 = vand.u32 4294901760, %v930_v12  ;;  %v4092_v17 = vand.u32 4294901760, %v3114_v61 }
  0x83   :  { %902 = vmatpush.msrb.mxu1 %v901_v42  ;;  %1019 = vmatpush.msrb.mxu3 %v2929_v34  ;;  %v78_v42 = vld [vmem:[%s4051_s1 + $0x1d0] sm:$0xff]  ;;  %v3100_v11 = vsub.f32 %v80_v51, %v3072_v59  ;;  %v1187_v51 = vsub.f32 %v3055_v35, %v4086_v24 }
  0x84   :  { %831 = vmatpush.msrb.mxu0 %v3003_v4  ;;  %982 = vmatpush.msrb.mxu2 %v2996_v47  ;;  %v3107_v1 = vand.u32 4294901760, %v78_v42 }
  0x85   :  { %908 = vmatpush.msrb.mxu1 %v907_v45  ;;  %1021 = vmatpush.msrb.mxu3 %v2947_v53  ;;  %v77_v45 = vld [vmem:[%s4051_s1 + $0x1c8] sm:$0xff]  ;;  %v4091_v24 = vand.u32 4294901760, %v3100_v11  ;;  %v1188_v12 = vand.u32 4294901760, %v1187_v51  ;;  %v3158_v51 = vand.u32 4294901760, %v75_v22 }
  0x86   :  { %833 = vmatpush.msrb.mxu0 %v3028_v44  ;;  %985 = vmatpush.msrb.mxu2 %v3014_v46  ;;  %v3125_v58 = vand.u32 4294901760, %v77_v45 }
  0x87   :  { %914 = vmatpush.msrb.mxu1 %v913_v39  ;;  %1023 = vmatpush.msrb.mxu3 %v2964_v8  ;;  %v76_v39 = vld [vmem:[%s4051_s1 + $0x1c0] sm:$0xff]  ;;  %v1205_v48 = vsub.f32 %v3100_v11, %v4091_v24  ;;  %v1211_v24 = vsub.f32 %v3114_v61, %v4092_v17 }
  0x88   :  { %839 = vmatmul.f32.vlgmr.msrb.gmra.mxu0 %v838_v54  ;;  %988 = vmatpush.msrb.mxu2 %v3034_v52  ;;  %v936_v54 = vsub.f32 %v3062_v5, %v4087_v32  ;;  %v3141_v32 = vand.u32 4294901760, %v76_v39 }
  0x89   :  { %1040 = vmatpush.msra.mxu0 %v845_v16  ;;  %920 = vmatpush.msrb.mxu1 %v919_v55  ;;  %v1193_v16 = vsub.f32 %v3079_v49, %v4090_v0  ;;  %v3139_v55 = vsub.f32 %v78_v42, %v3107_v1  ;;  %v1199_v42 = vsub.f32 %v3092_v57, %v4089_v36  ;;  %v3175_v0 = vand.u32 4294901760, %v74_v60 }
  0x8a   :  { %1025 = vmatpush.msrb.mxu3 %v2976_v38  ;;  %991 = vmatpush.msrb.mxu2 %v3062_v5  ;;  %v1212_v17 = vand.u32 4294901760, %v1211_v24  ;;  %v4158_v24 = vand.u32 4294901760, %v2901_v40  ;;  %v69_v40 = vld [vmem:[%s4051_s1 + $0x188] sm:$0xff] }
  0x8b   :  { %1044 = vmatpush.msra.mxu0 %v851_v13  ;;  %926 = vmatpush.msrb.mxu1 %v925_v50  ;;  %v937_v13 = vand.u32 4294901760, %v936_v54  ;;  %v3156_v50 = vsub.f32 %v77_v45, %v3125_v58  ;;  %v4155_v54 = vand.u32 4294901760, %v2852_v29  ;;  %v1194_v45 = vand.u32 4294901760, %v1193_v16  ;;  %v72_v29 = vld [vmem:[%s4051_s1 + $0x1a0] sm:$0xff] }
  0x8c   :  { %1027 = vmatpush.msrb.mxu3 %v3003_v4  ;;  %994 = vmatmul.f32.vlgmr.msrb.gmra.mxu2 %v2988_v23  ;;  %v4093_v36 = vand.u32 4294901760, %v3139_v55  ;;  %v4156_v23 = vand.u32 4294901760, %v2857_v19  ;;  %v3188_v16 = vsub.f32 %v75_v22, %v3158_v51 }
  0x8d   :  { %1048 = vmatpush.msra.mxu0 %v857_v37  ;;  %1144 = vmatpush.msra.mxu2 %v3019_v41  ;;  %v73_v37 = vld [vmem:[%s4051_s1 + $0x1a8] sm:$0xff] }
  0x8e   :  { %932 = vmatpush.msrb.mxu1 %v931_v18  ;;  %1029 = vmatpush.msrb.mxu3 %v3028_v44  ;;  %v3173_v18 = vsub.f32 %v76_v39, %v3141_v32  ;;  %v4095_v39 = vand.u32 4294901760, %v3156_v50  ;;  %v1217_v19 = vsub.f32 %v3139_v55, %v4093_v36 }
  0x8f   :  { %1033 = vmatmul.f32.vlgmr.msrb.gmra.mxu3 %v836_v10  ;;  %1052 = vmatpush.msra.mxu0 %v4155_v54  ;;  %v1200_v10 = vand.u32 4294901760, %v1199_v42  ;;  %v3190_v54 = vand.u32 4294901760, %v73_v37  ;;  %v3203_v42 = vsub.f32 %v74_v60, %v3175_v0 }
  0x90   :  { %1146 = vmatpush.msra.mxu2 %v3044_v31  ;;  %1189 = vmatpush.msra.mxu3 %v1188_v12  ;;  %v1206_v12 = vand.u32 4294901760, %v1205_v48  ;;  %v4094_v22 = vand.u32 4294901760, %v3173_v18  ;;  %v4157_v48 = vand.u32 4294901760, %v2874_v27  ;;  %v70_v27 = vld [vmem:[%s4051_s1 + $0x190] sm:$0xff] }
  0x91   :  { %938 = vmatpush.msrb.mxu1 %v937_v13  ;;  %1056 = vmatpush.msra.mxu0 %v4156_v23  ;;  %v71_v13 = vld [vmem:[%s4051_s1 + $0x198] sm:$0xff]  ;;  %v3205_v23 = vand.u32 4294901760, %v72_v29  ;;  %v3216_v60 = vsub.f32 %v73_v37, %v3190_v54 }
  0x92   :  { %940 = vmatmul.f32.vlgmr.msrb.gmra.mxu1 %v2958_v30  ;;  %1148 = vmatpush.msra.mxu2 %v3064_v3  ;;  %v3218_v36 = vand.u32 4294901760, %v71_v13  ;;  %v1229_v37 = vsub.f32 %v3173_v18, %v4094_v22  ;;  %v4161_v22 = vand.u32 4294901760, %v2951_v21  ;;  %v4163_v21 = vand.u32 4294901760, %v2968_v26 }
  0x93   :  { %1107 = vmatpush.msra.mxu1 %v2788_v28  ;;  %1195 = vmatpush.msra.mxu3 %v1194_v45  ;;  %v1223_v28 = vsub.f32 %v3156_v50, %v4095_v39  ;;  %v4096_v45 = vand.u32 4294901760, %v3188_v16 }
  0x94   :  { %1060 = vmatpush.msra.mxu0 %v4157_v48  ;;  %1150 = vmatpush.msra.mxu2 %v3072_v59  ;;  %v3232_v48 = vsub.f32 %v72_v29, %v3205_v23  ;;  %v3251_v39 = vsub.f32 %v71_v13, %v3218_v36 }
  0x95   :  { %1109 = vmatpush.msra.mxu1 %v2798_v62  ;;  %1201 = vmatpush.msra.mxu3 %v1200_v10  ;;  %v1218_v62 = vand.u32 4294901760, %v1217_v19  ;;  %v4097_v10 = vand.u32 4294901760, %v3203_v42  ;;  %v1224_v29 = vand.u32 4294901760, %v1223_v28  ;;  %v1235_v19 = vsub.f32 %v3188_v16, %v4096_v45 }
  0x96   :  { %1064 = vmatpush.msra.mxu0 %v4158_v24  ;;  %1152 = vmatpush.msra.mxu2 %v3084_v63  ;;  %v17_v24 = vld [vmem:[%s4052_s0 + $0x18] sm:$0xff]  ;;  %v1230_v28 = vand.u32 4294901760, %v1229_v37  ;;  %v1252_v45 = vand.u32 4294901760, %v3232_v48 }
  0x97   :  { %1111 = vmatpush.msra.mxu1 %v2808_v6  ;;  %1207 = vmatpush.msra.mxu3 %v1206_v12  ;;  %v4159_v6 = vand.u32 4294901760, %v2917_v7  ;;  %v3243_v12 = vand.u32 4294901760, %v70_v27  ;;  %v68_v7 = vld [vmem:[%s4051_s1 + $0x180] sm:$0xff]  ;;  %v1241_v13 = vsub.f32 %v3203_v42, %v4097_v10  ;;  %v1258_v10 = vand.u32 4294901760, %v3251_v39 }
  0x98   :  { %1154 = vmatpush.msra.mxu2 %v3107_v1 }
  0x99   :  { %1068 = vmatpush.msra.mxu0 %v4159_v6  ;;  %1113 = vmatpush.msra.mxu1 %v2821_v15  ;;  %v4160_v6 = vand.u32 4294901760, %v2933_v43  ;;  %v3259_v15 = vand.u32 4294901760, %v69_v40  ;;  %v3272_v43 = vsub.f32 %v70_v27, %v3243_v12 }
  0x9a   :  { %1213 = vmatpush.msra.mxu3 %v1212_v17  ;;  %1156 = vmatpush.msra.mxu2 %v3125_v58  ;;  %v3261_v17 = vand.u32 4294901760, %v17_v24 }
  0x9b   :  { %1072 = vmatpush.msra.mxu0 %v4160_v6  ;;  %1115 = vmatpush.msra.mxu1 %v2831_v2  ;;  %v3274_v6 = vand.u32 4294901760, %v68_v7  ;;  %v1236_v2 = vand.u32 4294901760, %v1235_v19  ;;  %v4164_v19 = vand.u32 4294901760, %v2980_v56  ;;  %v1264_v26 = vand.u32 4294901760, %v3272_v43 }
  0x9c   :  { %1219 = vmatpush.msra.mxu3 %v1218_v62  ;;  %1158 = vmatpush.msra.mxu2 %v3141_v32  ;;  %v4162_v62 = vand.u32 4294901760, %v3216_v60  ;;  %v3288_v27 = vsub.f32 %v17_v24, %v3261_v17  ;;  %v1259_v24 = vsub.f32 %v3251_v39, %v1258_v10 }
  0x9d   :  { %1076 = vmatpush.msra.mxu0 %v4161_v22  ;;  %1117 = vmatpush.msra.mxu1 %v2842_v20  ;;  %v3285_v22 = vsub.f32 %v69_v40, %v3259_v15  ;;  %v1242_v20 = vand.u32 4294901760, %v1241_v13  ;;  %v3299_v40 = vsub.f32 %v68_v7, %v3274_v6 }
  0x9e   :  { %1225 = vmatpush.msra.mxu3 %v1224_v29  ;;  %v1247_v37 = vsub.f32 %v3216_v60, %v4162_v62  ;;  %1160 = vmatpush.msra.mxu2 %v3158_v51  ;;  %v1253_v29 = vsub.f32 %v3232_v48, %v1252_v45  ;;  %v1177_v13 = vand.u32 4294901760, %v3288_v27  ;;  %v1260_v62 = vand.u32 4294901760, %v1259_v24 }
  0x9f   :  { %1080 = vmatpush.msra.mxu0 %v4163_v21  ;;  %1119 = vmatpush.msra.mxu1 %v2868_v9  ;;  %v1270_v56 = vand.u32 4294901760, %v3285_v22 }
  0xa0   :  { %1231 = vmatpush.msra.mxu3 %v1230_v28  ;;  %1162 = vmatpush.msra.mxu2 %v3175_v0  ;;  %v1248_v9 = vand.u32 4294901760, %v1247_v37  ;;  %v4165_v28 = vand.u32 4294901760, %v2996_v47  ;;  %v1254_v7 = vand.u32 4294901760, %v1253_v29  ;;  %v1265_v47 = vsub.f32 %v3272_v43, %v1264_v26  ;;  %v91_v29 = vld [vmem:[%s4051_s1 + $0x238] sm:$0xff] }
  0xa1   :  { %1084 = vmatpush.msra.mxu0 %v4164_v19  ;;  %1121 = vmatpush.msra.mxu1 %v2884_v14  ;;  %v4166_v14 = vand.u32 4294901760, %v3014_v46  ;;  %v4167_v37 = vand.u32 4294901760, %v3034_v52  ;;  %v1178_v46 = vsub.f32 %v3288_v27, %v1177_v13 }
  0xa2   :  { %1237 = vmatpush.msra.mxu3 %v1236_v2  ;;  %1164 = vmatpush.msra.mxu2 %v3190_v54  ;;  %v1276_v2 = vand.u32 4294901760, %v3299_v40  ;;  %v1266_v52 = vand.u32 4294901760, %v1265_v47 }
  0xa3   :  { %1088 = vmatpush.msra.mxu0 %v4165_v28  ;;  %1123 = vmatpush.msra.mxu1 %v2898_v25  ;;  %v1271_v25 = vsub.f32 %v3285_v22, %v1270_v56 }
  0xa4   :  { %1243 = vmatpush.msra.mxu3 %v1242_v20  ;;  %1166 = vmatpush.msra.mxu2 %v3205_v23  ;;  %v1277_v21 = vsub.f32 %v3299_v40, %v1276_v2 }
  0xa5   :  { %1092 = vmatpush.msra.mxu0 %v4166_v14  ;;  %1125 = vmatpush.msra.mxu1 %v2914_v33  ;;  %v4168_v33 = vand.u32 4294901760, %v3062_v5  ;;  %v1272_v20 = vand.u32 4294901760, %v1271_v25 }
  0xa6   :  { %1249 = vmatpush.msra.mxu3 %v1248_v9  ;;  %1168 = vmatpush.msra.mxu2 %v3218_v36  ;;  %v1278_v5 = vand.u32 4294901760, %v1277_v21  ;;  %v90_v9 = vld [vmem:[%s4051_s1 + $0x230] sm:$0xff]  ;;  %v87_v21 = vld [vmem:[%s4051_s1 + $0x218] sm:$0xff] }
  0xa7   :  { %1096 = vmatpush.msra.mxu0 %v4167_v37  ;;  %1127 = vmatpush.msra.mxu1 %v2929_v34  ;;  %v1179_v34 = vand.u32 4294901760, %v1178_v46  ;;  %v88_v37 = vld [vmem:[%s4051_s1 + $0x220] sm:$0xff] }
  0xa8   :  { %1255 = vmatpush.msra.mxu3 %v1254_v7  ;;  %1170 = vmatpush.msra.mxu2 %v3243_v12 }
  0xa9   :  { %1100 = vmatpush.msra.mxu0 %v4168_v33  ;;  %1129 = vmatpush.msra.mxu1 %v2947_v53  ;;  %v4169_v53 = vand.u32 4294901760, %v3055_v35 }
  0xaa   :  { %1261 = vmatpush.msra.mxu3 %v1260_v62  ;;  %1102 = vmatmul.f32.vlgmr.msra.gmra.mxu0 %v2958_v30 }
  0xab   :  { %1172 = vmatpush.msra.mxu2 %v3259_v15  ;;  %1287 = vmatpush.msrb.mxu0 %v3055_v35 }
  0xac   :  { %1131 = vmatpush.msra.mxu1 %v2964_v8  ;;  %1267 = vmatpush.msra.mxu3 %v1266_v52  ;;  %v4170_v8 = vand.u32 4294901760, %v3079_v49 }
  0xad   :  { %1174 = vmatpush.msra.mxu2 %v3274_v6  ;;  %1290 = vmatpush.msrb.mxu0 %v3079_v49  ;;  %v4178_v49 = vand.u32 4294901760, %v3203_v42 }
  0xae   :  { %1133 = vmatpush.msra.mxu1 %v2976_v38  ;;  %1273 = vmatpush.msra.mxu3 %v1272_v20  ;;  %v4171_v38 = vand.u32 4294901760, %v3092_v57 }
  0xaf   :  { %1180 = vmatmul.f32.vlgmr.msra.gmra.mxu2 %v1179_v34  ;;  %1293 = vmatpush.msrb.mxu0 %v3092_v57  ;;  %v3559_v34 = vand.u32 4294901760, %v88_v37 }
  0xb0   :  { %1381 = vmatpush.msrb.mxu2 %v4169_v53  ;;  %1135 = vmatpush.msra.mxu1 %v3003_v4  ;;  %v4172_v4 = vand.u32 4294901760, %v3100_v11 }
  0xb1   :  { %1279 = vmatpush.msra.mxu3 %v1278_v5  ;;  %1296 = vmatpush.msrb.mxu0 %v3100_v11  ;;  %v4175_v11 = vand.u32 4294901760, %v3156_v50 }
  0xb2   :  { %1281 = vmatmul.f32.vlgmr.msra.gmra.mxu3 %v3261_v17  ;;  %1385 = vmatpush.msrb.mxu2 %v4170_v8 }
  0xb3   :  { %1448 = vmatpush.msrb.mxu3 %v3019_v41  ;;  %1137 = vmatpush.msra.mxu1 %v3028_v44  ;;  %v4177_v44 = vand.u32 4294901760, %v3188_v16 }
  0xb4   :  { %1299 = vmatpush.msrb.mxu0 %v3114_v61  ;;  %1139 = vmatmul.f32.vlgmr.msra.gmra.mxu1 %v2958_v30  ;;  %v4173_v30 = vand.u32 4294901760, %v3114_v61  ;;  %v96_v61 = vld [vmem:[%s4051_s1 + $0x260] sm:$0xff] }
  0xb5   :  { %1389 = vmatpush.msrb.mxu2 %v4171_v38  ;;  %1340 = vmatpush.msrb.mxu1 %v3019_v41  ;;  %v4174_v41 = vand.u32 4294901760, %v3139_v55  ;;  %v86_v38 = vld [vmem:[%s4051_s1 + $0x210] sm:$0xff] }
  0xb6   :  { %1450 = vmatpush.msrb.mxu3 %v3044_v31  ;;  %1302 = vmatpush.msrb.mxu0 %v3139_v55  ;;  %v95_v55 = vld [vmem:[%s4051_s1 + $0x258] sm:$0xff] }
  0xb7   :  { %1393 = vmatpush.msrb.mxu2 %v4172_v4  ;;  %1342 = vmatpush.msrb.mxu1 %v3044_v31  ;;  %v97_v31 = vld [vmem:[%s4051_s1 + $0x268] sm:$0xff] }
  0xb8   :  { %1452 = vmatpush.msrb.mxu3 %v3064_v3  ;;  %1305 = vmatpush.msrb.mxu0 %v3156_v50 }
  0xb9   :  { %1397 = vmatpush.msrb.mxu2 %v4173_v30  ;;  %1344 = vmatpush.msrb.mxu1 %v3064_v3  ;;  %v4176_v3 = vand.u32 4294901760, %v3173_v18 }
  0xba   :  { %1454 = vmatpush.msrb.mxu3 %v3072_v59  ;;  %1308 = vmatpush.msrb.mxu0 %v3173_v18  ;;  %v3444_v18 = vand.u32 4294901760, %v95_v55 }
  0xbb   :  { %1401 = vmatpush.msrb.mxu2 %v4174_v41  ;;  %1346 = vmatpush.msrb.mxu1 %v3072_v59  ;;  %v3420_v59 = vand.u32 4294901760, %v97_v31  ;;  %v3576_v41 = vand.u32 4294901760, %v87_v21 }
  0xbc   :  { %1456 = vmatpush.msrb.mxu3 %v3084_v63  ;;  %1311 = vmatpush.msrb.mxu0 %v3188_v16 }
  0xbd   :  { %1405 = vmatpush.msrb.mxu2 %v4175_v11  ;;  %1348 = vmatpush.msrb.mxu1 %v3084_v63  ;;  %v99_v63 = vld [vmem:[%s4051_s1 + $0x278] sm:$0xff]  ;;  %v3450_v16 = vsub.f32 %v97_v31, %v3420_v59  ;;  %v85_v31 = vld [vmem:[%s4051_s1 + $0x208] sm:$0xff] }
  0xbe   :  { %1458 = vmatpush.msrb.mxu3 %v3107_v1  ;;  %1314 = vmatpush.msrb.mxu0 %v3203_v42  ;;  %v3400_v57 = vand.u32 4294901760, %v99_v63  ;;  %v93_v42 = vld [vmem:[%s4051_s1 + $0x248] sm:$0xff] }
  0xbf   :  { %1409 = vmatpush.msrb.mxu2 %v4176_v3  ;;  %1350 = vmatpush.msrb.mxu1 %v3107_v1  ;;  %v98_v1 = vld [vmem:[%s4051_s1 + $0x270] sm:$0xff] }
  0xc0   :  { %1460 = vmatpush.msrb.mxu3 %v3125_v58  ;;  %1317 = vmatpush.msrb.mxu0 %v3216_v60  ;;  %v3410_v35 = vand.u32 4294901760, %v98_v1 }
  0xc1   :  { %1413 = vmatpush.msrb.mxu2 %v4177_v44  ;;  %1352 = vmatpush.msrb.mxu1 %v3125_v58  ;;  %v4179_v58 = vand.u32 4294901760, %v3216_v60  ;;  %v3470_v60 = vsub.f32 %v95_v55, %v3444_v18 }
  0xc2   :  { %1462 = vmatpush.msrb.mxu3 %v3141_v32  ;;  %1320 = vmatpush.msrb.mxu0 %v3232_v48  ;;  %v3436_v50 = vsub.f32 %v98_v1, %v3410_v35  ;;  %v3480_v48 = vand.u32 4294901760, %v93_v42 }
  0xc3   :  { %1417 = vmatpush.msrb.mxu2 %v4178_v49  ;;  %1354 = vmatpush.msrb.mxu1 %v3141_v32  ;;  %v3423_v32 = vsub.f32 %v99_v63, %v3400_v57  ;;  %v3588_v49 = vand.u32 4294901760, %v86_v38 }
  0xc4   :  { %1464 = vmatpush.msrb.mxu3 %v3158_v51  ;;  %1323 = vmatpush.msrb.mxu0 %v3251_v39 }
  0xc5   :  { %1421 = vmatpush.msrb.mxu2 %v4179_v58  ;;  %1356 = vmatpush.msrb.mxu1 %v3158_v51  ;;  %v94_v51 = vld [vmem:[%s4051_s1 + $0x250] sm:$0xff]  ;;  %v1527_v39 = vand.u32 4294901760, %v3423_v32  ;;  %v3592_v58 = vsub.f32 %v88_v37, %v3559_v34 }
  0xc6   :  { %1466 = vmatpush.msrb.mxu3 %v3175_v0  ;;  %1326 = vmatpush.msrb.mxu0 %v3272_v43  ;;  %v1539_v43 = vand.u32 4294901760, %v3450_v16 }
  0xc7   :  { %1425 = vmatpush.msrb.mxu2 %v1252_v45  ;;  %1358 = vmatpush.msrb.mxu1 %v3175_v0  ;;  %v3433_v0 = vand.u32 4294901760, %v96_v61 }
  0xc8   :  { %1468 = vmatpush.msrb.mxu3 %v3190_v54  ;;  %1329 = vmatpush.msrb.mxu0 %v3285_v22  ;;  %v1540_v28 = vsub.f32 %v3450_v16, %v1539_v43 }
  0xc9   :  { %1429 = vmatpush.msrb.mxu2 %v1258_v10  ;;  %1360 = vmatpush.msrb.mxu1 %v3190_v54  ;;  %v3455_v54 = vand.u32 4294901760, %v94_v51  ;;  %v3464_v45 = vsub.f32 %v96_v61, %v3433_v0  ;;  %v92_v10 = vld [vmem:[%s4051_s1 + $0x240] sm:$0xff] }
  0xca   :  { %1470 = vmatpush.msrb.mxu3 %v3205_v23  ;;  %1332 = vmatpush.msrb.mxu0 %v3299_v40  ;;  %v3496_v19 = vand.u32 4294901760, %v92_v10  ;;  %v4108_v40 = vand.u32 4294901760, %v3470_v60  ;;  %v1541_v25 = vand.u32 4294901760, %v1540_v28  ;;  %v4098_v28 = vand.u32 4294901760, %v3592_v58 }
  0xcb   :  { %1433 = vmatpush.msrb.mxu2 %v1264_v26  ;;  %1362 = vmatpush.msrb.mxu1 %v3205_v23  ;;  %v1533_v23 = vand.u32 4294901760, %v3436_v50  ;;  %v3486_v22 = vsub.f32 %v94_v51, %v3455_v54  ;;  %v4111_v26 = vand.u32 4294901760, %v3464_v45 }
  0xcc   :  { %1472 = vmatpush.msrb.mxu3 %v3218_v36  ;;  %1335 = vmatmul.f32.vlgmr.msrb.gmra.mxu0 %v3288_v27  ;;  %v3529_v62 = vsub.f32 %v92_v10, %v3496_v19  ;;  %v3608_v10 = vsub.f32 %v87_v21, %v3576_v41 }
  0xcd   :  { %1437 = vmatpush.msrb.mxu2 %v1270_v56  ;;  %1485 = vmatpush.msra.mxu0 %v3400_v57  ;;  %v3510_v56 = vand.u32 4294901760, %v91_v29  ;;  %v4106_v7 = vand.u32 4294901760, %v3486_v22  ;;  %v1546_v47 = vsub.f32 %v3464_v45, %v4111_v26 }
  0xce   :  { %1364 = vmatpush.msrb.mxu1 %v3218_v36  ;;  %1474 = vmatpush.msrb.mxu3 %v3243_v12  ;;  %v1528_v36 = vsub.f32 %v3423_v32, %v1527_v39  ;;  %v4103_v5 = vand.u32 4294901760, %v3529_v62 }
  0xcf   :  { %1441 = vmatpush.msrb.mxu2 %v1276_v2  ;;  %1487 = vmatpush.msra.mxu0 %v3410_v35  ;;  %v3526_v2 = vand.u32 4294901760, %v90_v9  ;;  %v3545_v27 = vsub.f32 %v91_v29, %v3510_v56  ;;  %v1558_v52 = vsub.f32 %v3486_v22, %v4106_v7  ;;  %v1547_v20 = vand.u32 4294901760, %v1546_v47 }
  0xd0   :  { %1366 = vmatpush.msrb.mxu1 %v3243_v12  ;;  %1476 = vmatpush.msrb.mxu3 %v3259_v15  ;;  %v1534_v12 = vsub.f32 %v3436_v50, %v1533_v23  ;;  %v1529_v24 = vand.u32 4294901760, %v1528_v36  ;;  %v1570_v63 = vsub.f32 %v3529_v62, %v4103_v5  ;;  %v115_v36 = vld [vmem:[%s4051_s1 + $0x2f8] sm:$0xff]  ;;  %v3615_v29 = vand.u32 4294901760, %v85_v31 }
  0xd1   :  { %1443 = vmatmul.f32.vlgmr.msrb.gmra.mxu2 %v3261_v17  ;;  %1489 = vmatpush.msra.mxu0 %v3420_v59  ;;  %v3563_v53 = vsub.f32 %v90_v9, %v3526_v2  ;;  %v4102_v11 = vand.u32 4294901760, %v3545_v27  ;;  %v1559_v44 = vand.u32 4294901760, %v1558_v52  ;;  %v3631_v47 = vand.u32 4294901760, %v115_v36 }
  0xd2   :  { %1628 = vmatpush.msra.mxu2 %v3423_v32  ;;  %1368 = vmatpush.msrb.mxu1 %v3259_v15  ;;  %v3513_v15 = vsub.f32 %v93_v42, %v3480_v48  ;;  %v1535_v14 = vand.u32 4294901760, %v1534_v12  ;;  %v84_v12 = vld [vmem:[%s4051_s1 + $0x200] sm:$0xff]  ;;  %v1571_v9 = vand.u32 4294901760, %v1570_v63  ;;  %v4100_v52 = vand.u32 4294901760, %v3608_v10  ;;  %v107_v32 = vld [vmem:[%s4051_s1 + $0x2b8] sm:$0xff] }
  0xd3   :  { %1478 = vmatpush.msrb.mxu3 %v3274_v6  ;;  %1491 = vmatpush.msra.mxu0 %v3433_v0  ;;  %v4101_v1 = vand.u32 4294901760, %v3563_v53  ;;  %v1576_v51 = vsub.f32 %v3545_v27, %v4102_v11  ;;  %v3646_v21 = vsub.f32 %v85_v31, %v3615_v29  ;;  %v112_v63 = vld [vmem:[%s4051_s1 + $0x2e0] sm:$0xff] }
  0xd4   :  { %1480 = vmatmul.f32.vlgmr.msrb.gmra.mxu3 %v3261_v17  ;;  %1631 = vmatpush.msra.mxu2 %v3436_v50  ;;  %v89_v17 = vld [vmem:[%s4051_s1 + $0x228] sm:$0xff]  ;;  %v4105_v33 = vand.u32 4294901760, %v3513_v15  ;;  %v106_v50 = vld [vmem:[%s4051_s1 + $0x2b0] sm:$0xff] }
  0xd5   :  { %1681 = vmatpush.msra.mxu3 %v3400_v57  ;;  %1370 = vmatpush.msrb.mxu1 %v3274_v6  ;;  %v1552_v6 = vsub.f32 %v3470_v60, %v4108_v40  ;;  %v3541_v46 = vand.u32 4294901760, %v89_v17  ;;  %v1577_v37 = vand.u32 4294901760, %v1576_v51 }
  0xd6   :  { %1493 = vmatpush.msra.mxu0 %v3444_v18  ;;  %1374 = vmatmul.f32.vlgmr.msrb.gmra.mxu1 %v1177_v13  ;;  %v18_v13 = vld [vmem:[%s4052_s0 + $0x20] sm:$0xff]  ;;  %v1564_v30 = vsub.f32 %v3513_v15, %v4105_v33 }
  0xd7   :  { %1634 = vmatpush.msra.mxu2 %v3450_v16  ;;  %1530 = vmatpush.msra.mxu1 %v1529_v24  ;;  %v1553_v8 = vand.u32 4294901760, %v1552_v6  ;;  %v3570_v4 = vand.u32 4294901760, %v18_v13  ;;  %v3580_v3 = vsub.f32 %v89_v17, %v3541_v46  ;;  %v1582_v24 = vsub.f32 %v3563_v53, %v4101_v1  ;;  %v114_v6 = vld [vmem:[%s4051_s1 + $0x2f0] sm:$0xff] }
  0xd8   :  { %1683 = vmatpush.msra.mxu3 %v3410_v35  ;;  %1495 = vmatpush.msra.mxu0 %v3455_v54  ;;  %v1565_v55 = vand.u32 4294901760, %v1564_v30  ;;  %v3626_v17 = vsub.f32 %v86_v38, %v3588_v49  ;;  %v1594_v38 = vsub.f32 %v3592_v58, %v4098_v28 }
  0xd9   :  { %1637 = vmatpush.msra.mxu2 %v3464_v45  ;;  %1536 = vmatpush.msra.mxu1 %v1535_v14  ;;  %v3600_v61 = vsub.f32 %v18_v13, %v3570_v4  ;;  %v4099_v42 = vand.u32 4294901760, %v3580_v3  ;;  %v3640_v13 = vand.u32 4294901760, %v84_v12 }
  0xda   :  { %1685 = vmatpush.msra.mxu3 %v3420_v59  ;;  %1497 = vmatpush.msra.mxu0 %v3480_v48  ;;  %v4104_v30 = vand.u32 4294901760, %v3626_v17 }
  0xdb   :  { %1640 = vmatpush.msra.mxu2 %v3470_v60  ;;  %1542 = vmatpush.msra.mxu1 %v1541_v25  ;;  %v1518_v14 = vand.u32 4294901760, %v3600_v61  ;;  %v1588_v25 = vsub.f32 %v3580_v3, %v4099_v42  ;;  %v111_v42 = vld [vmem:[%s4051_s1 + $0x2d8] sm:$0xff] }
  0xdc   :  { %1687 = vmatpush.msra.mxu3 %v3433_v0  ;;  %1499 = vmatpush.msra.mxu0 %v3496_v19  ;;  %v3696_v5 = vand.u32 4294901760, %v111_v42 }
  0xdd   :  { %1643 = vmatpush.msra.mxu2 %v3486_v22  ;;  %1548 = vmatpush.msra.mxu1 %v1547_v20  ;;  %v113_v20 = vld [vmem:[%s4051_s1 + $0x2e8] sm:$0xff]  ;;  %v1519_v31 = vsub.f32 %v3600_v61, %v1518_v14  ;;  %v1589_v51 = vand.u32 4294901760, %v1588_v25  ;;  %v1595_v25 = vand.u32 4294901760, %v1594_v38 }
  0xde   :  { %1689 = vmatpush.msra.mxu3 %v3444_v18  ;;  %1501 = vmatpush.msra.mxu0 %v3510_v56  ;;  %v3676_v28 = vand.u32 4294901760, %v113_v20 }
  0xdf   :  { %1646 = vmatpush.msra.mxu2 %v3513_v15  ;;  %1554 = vmatpush.msra.mxu1 %v1553_v8  ;;  %v1583_v8 = vand.u32 4294901760, %v1582_v24  ;;  %v3674_v24 = vsub.f32 %v84_v12, %v3640_v13  ;;  %v1606_v12 = vsub.f32 %v3626_v17, %v4104_v30  ;;  %v1520_v1 = vand.u32 4294901760, %v1519_v31 }
  0xe0   :  { %1691 = vmatpush.msra.mxu3 %v3455_v54  ;;  %1503 = vmatpush.msra.mxu0 %v3526_v2  ;;  %v3704_v30 = vsub.f32 %v113_v20, %v3676_v28 }
  0xe1   :  { %1649 = vmatpush.msra.mxu2 %v3529_v62  ;;  %1560 = vmatpush.msra.mxu1 %v1559_v44  ;;  %v3656_v44 = vand.u32 4294901760, %v114_v6  ;;  %v1607_v20 = vand.u32 4294901760, %v1606_v12 }
  0xe2   :  { %1693 = vmatpush.msra.mxu3 %v3480_v48  ;;  %1505 = vmatpush.msra.mxu0 %v3541_v46  ;;  %v4112_v12 = vand.u32 4294901760, %v3704_v30 }
  0xe3   :  { %1652 = vmatpush.msra.mxu2 %v3545_v27  ;;  %1566 = vmatpush.msra.mxu1 %v1565_v55  ;;  %v3667_v55 = vsub.f32 %v115_v36, %v3631_v47  ;;  %v4107_v36 = vand.u32 4294901760, %v3646_v21 }
  0xe4   :  { %1695 = vmatpush.msra.mxu3 %v3496_v19  ;;  %1507 = vmatpush.msra.mxu0 %v3559_v34 }
  0xe5   :  { %1655 = vmatpush.msra.mxu2 %v3563_v53  ;;  %1572 = vmatpush.msra.mxu1 %v1571_v9  ;;  %v1600_v9 = vsub.f32 %v3608_v10, %v4100_v52  ;;  %v3691_v52 = vsub.f32 %v114_v6, %v3656_v44  ;;  %v4109_v11 = vand.u32 4294901760, %v3667_v55  ;;  %v4110_v6 = vand.u32 4294901760, %v3674_v24 }
  0xe6   :  { %1697 = vmatpush.msra.mxu3 %v3510_v56  ;;  %1509 = vmatpush.msra.mxu0 %v3576_v41  ;;  %v1612_v31 = vsub.f32 %v3646_v21, %v4107_v36  ;;  %v3726_v36 = vsub.f32 %v111_v42, %v3696_v5 }
  0xe7   :  { %1658 = vmatpush.msra.mxu2 %v3580_v3  ;;  %1578 = vmatpush.msra.mxu1 %v1577_v37  ;;  %v3684_v37 = vand.u32 4294901760, %v112_v63  ;;  %v1601_v38 = vand.u32 4294901760, %v1600_v9  ;;  %v4113_v9 = vand.u32 4294901760, %v3691_v52 }
  0xe8   :  { %1699 = vmatpush.msra.mxu3 %v3526_v2  ;;  %1511 = vmatpush.msra.mxu0 %v3588_v49  ;;  %v1613_v42 = vand.u32 4294901760, %v1612_v31  ;;  %v4115_v26 = vand.u32 4294901760, %v3726_v36 }
  0xe9   :  { %1661 = vmatpush.msra.mxu2 %v3592_v58  ;;  %1584 = vmatpush.msra.mxu1 %v1583_v8  ;;  %v110_v8 = vld [vmem:[%s4051_s1 + $0x2d0] sm:$0xff]  ;;  %v3712_v33 = vsub.f32 %v112_v63, %v3684_v37  ;;  %v1869_v63 = vsub.f32 %v3667_v55, %v4109_v11 }
  0xea   :  { %1701 = vmatpush.msra.mxu3 %v3541_v46  ;;  %1513 = vmatpush.msra.mxu0 %v3615_v29  ;;  %v3719_v7 = vand.u32 4294901760, %v110_v8 }
  0xeb   :  { %1664 = vmatpush.msra.mxu2 %v3608_v10  ;;  %1590 = vmatpush.msra.mxu1 %v1589_v51  ;;  %v109_v51 = vld [vmem:[%s4051_s1 + $0x2c8] sm:$0xff]  ;;  %v4114_v11 = vand.u32 4294901760, %v3712_v33  ;;  %v1870_v31 = vand.u32 4294901760, %v1869_v63  ;;  %v3770_v63 = vand.u32 4294901760, %v107_v32 }
  0xec   :  { %1703 = vmatpush.msra.mxu3 %v3559_v34  ;;  %1515 = vmatpush.msra.mxu0 %v3640_v13  ;;  %v3737_v40 = vand.u32 4294901760, %v109_v51 }
  0xed   :  { %1667 = vmatpush.msra.mxu2 %v3626_v17  ;;  %1596 = vmatpush.msra.mxu1 %v1595_v25  ;;  %v108_v25 = vld [vmem:[%s4051_s1 + $0x2c0] sm:$0xff]  ;;  %v1887_v16 = vsub.f32 %v3712_v33, %v4114_v11  ;;  %v1893_v11 = vsub.f32 %v3726_v36, %v4115_v26 }
  0xee   :  { %1705 = vmatpush.msra.mxu3 %v3576_v41  ;;  %1521 = vmatmul.f32.vlgmr.msra.gmra.mxu0 %v1520_v1  ;;  %v1618_v1 = vsub.f32 %v3674_v24, %v4110_v6  ;;  %v3753_v6 = vand.u32 4294901760, %v108_v25 }
  0xef   :  { %1670 = vmatpush.msra.mxu2 %v3646_v21  ;;  %1722 = vmatpush.msrb.mxu0 %v1527_v39  ;;  %v1875_v39 = vsub.f32 %v3691_v52, %v4113_v9  ;;  %v3787_v9 = vand.u32 4294901760, %v106_v50  ;;  %v1894_v26 = vand.u32 4294901760, %v1893_v11  ;;  %v4183_v11 = vand.u32 4294901760, %v3513_v15  ;;  %v101_v15 = vld [vmem:[%s4051_s1 + $0x288] sm:$0xff] }
  0xf0   :  { %1602 = vmatpush.msra.mxu1 %v1601_v38  ;;  %1707 = vmatpush.msra.mxu3 %v3588_v49  ;;  %v3751_v38 = vsub.f32 %v110_v8, %v3719_v7  ;;  %v1881_v8 = vsub.f32 %v3704_v30, %v4112_v12 }
  0xf1   :  { %1673 = vmatpush.msra.mxu2 %v3674_v24  ;;  %1726 = vmatpush.msrb.mxu0 %v1533_v23  ;;  %v1619_v23 = vand.u32 4294901760, %v1618_v1  ;;  %v4180_v1 = vand.u32 4294901760, %v3464_v45  ;;  %v104_v45 = vld [vmem:[%s4051_s1 + $0x2a0] sm:$0xff] }
  0xf2   :  { %1608 = vmatpush.msra.mxu1 %v1607_v20  ;;  %1709 = vmatpush.msra.mxu3 %v3615_v29  ;;  %v3768_v20 = vsub.f32 %v109_v51, %v3737_v40  ;;  %v1876_v51 = vand.u32 4294901760, %v1875_v39  ;;  %v4116_v12 = vand.u32 4294901760, %v3751_v38  ;;  %v3800_v39 = vsub.f32 %v107_v32, %v3770_v63 }
  0xf3   :  { %1676 = vmatmul.f32.vlgmr.msra.gmra.mxu2 %v3600_v61  ;;  %1730 = vmatpush.msrb.mxu0 %v1539_v43  ;;  %v105_v43 = vld [vmem:[%s4051_s1 + $0x2a8] sm:$0xff]  ;;  %v4181_v61 = vand.u32 4294901760, %v3470_v60 }
  0xf4   :  { %1826 = vmatpush.msrb.mxu2 %v3631_v47  ;;  %1614 = vmatpush.msra.mxu1 %v1613_v42  ;;  %v3785_v42 = vsub.f32 %v108_v25, %v3753_v6  ;;  %v4118_v25 = vand.u32 4294901760, %v3768_v20  ;;  %v1899_v60 = vsub.f32 %v3751_v38, %v4116_v12 }
  0xf5   :  { %1711 = vmatpush.msra.mxu3 %v3640_v13  ;;  %1734 = vmatpush.msrb.mxu0 %v4180_v1  ;;  %v3802_v1 = vand.u32 4294901760, %v105_v43 }
  0xf6   :  { %1715 = vmatmul.f32.vlgmr.msra.gmra.mxu3 %v1518_v14  ;;  %1828 = vmatpush.msrb.mxu2 %v3656_v44  ;;  %v1882_v14 = vand.u32 4294901760, %v1881_v8  ;;  %v4117_v32 = vand.u32 4294901760, %v3785_v42  ;;  %v3815_v8 = vsub.f32 %v106_v50, %v3787_v9 }
  0xf7   :  { %1871 = vmatpush.msrb.mxu3 %v1870_v31  ;;  %1620 = vmatpush.msra.mxu1 %v1619_v23  ;;  %v1888_v31 = vand.u32 4294901760, %v1887_v16  ;;  %v103_v23 = vld [vmem:[%s4051_s1 + $0x298] sm:$0xff]  ;;  %v4182_v16 = vand.u32 4294901760, %v3486_v22  ;;  %v3828_v50 = vsub.f32 %v105_v43, %v3802_v1  ;;  %v102_v22 = vld [vmem:[%s4051_s1 + $0x290] sm:$0xff] }
  0xf8   :  { %1738 = vmatpush.msrb.mxu0 %v4181_v61  ;;  %1622 = vmatmul.f32.vlgmr.msra.gmra.mxu1 %v3570_v4  ;;  %v3817_v61 = vand.u32 4294901760, %v104_v45  ;;  %v3830_v12 = vand.u32 4294901760, %v103_v23  ;;  %v1911_v43 = vsub.f32 %v3785_v42, %v4117_v32  ;;  %v4186_v32 = vand.u32 4294901760, %v3563_v53 }
  0xf9   :  { %1830 = vmatpush.msrb.mxu2 %v3676_v28  ;;  %1789 = vmatpush.msrb.mxu1 %v3400_v57  ;;  %v1905_v57 = vsub.f32 %v3768_v20, %v4118_v25  ;;  %v4188_v53 = vand.u32 4294901760, %v3580_v3 }
  0xfa   :  { %1877 = vmatpush.msrb.mxu3 %v1876_v51  ;;  %1742 = vmatpush.msrb.mxu0 %v4182_v16  ;;  %v4119_v51 = vand.u32 4294901760, %v3800_v39  ;;  %v3844_v16 = vsub.f32 %v104_v45, %v3817_v61  ;;  %v3863_v25 = vsub.f32 %v103_v23, %v3830_v12 }
  0xfb   :  { %1832 = vmatpush.msrb.mxu2 %v3684_v37  ;;  %1791 = vmatpush.msrb.mxu1 %v3410_v35  ;;  %v1900_v35 = vand.u32 4294901760, %v1899_v60  ;;  %v1906_v45 = vand.u32 4294901760, %v1905_v57  ;;  %v1912_v57 = vand.u32 4294901760, %v1911_v43 }
  0xfc   :  { %1883 = vmatpush.msrb.mxu3 %v1882_v14  ;;  %1746 = vmatpush.msrb.mxu0 %v4183_v11  ;;  %v4120_v14 = vand.u32 4294901760, %v3815_v8  ;;  %v19_v11 = vld [vmem:[%s4052_s0 + $0x28] sm:$0xff]  ;;  %v1917_v60 = vsub.f32 %v3800_v39, %v4119_v51  ;;  %v1934_v51 = vand.u32 4294901760, %v3844_v16 }
  0xfd   :  { %1834 = vmatpush.msrb.mxu2 %v3696_v5  ;;  %1793 = vmatpush.msrb.mxu1 %v3420_v59  ;;  %v4184_v59 = vand.u32 4294901760, %v3529_v62  ;;  %v100_v62 = vld [vmem:[%s4051_s1 + $0x280] sm:$0xff] }
  0xfe   :  { %1889 = vmatpush.msrb.mxu3 %v1888_v31  ;;  %v3855_v31 = vand.u32 4294901760, %v102_v22  ;;  %v1923_v23 = vsub.f32 %v3815_v8, %v4120_v14  ;;  %v1940_v14 = vand.u32 4294901760, %v3863_v25 }
  0xff   :  { %1750 = vmatpush.msrb.mxu0 %v4184_v59  ;;  %1836 = vmatpush.msrb.mxu2 %v3719_v7  ;;  %v4185_v59 = vand.u32 4294901760, %v3545_v27 }
 0x100   :  { %1795 = vmatpush.msrb.mxu1 %v3433_v0  ;;  %1895 = vmatpush.msrb.mxu3 %v1894_v26  ;;  %v3871_v0 = vand.u32 4294901760, %v101_v15  ;;  %v3873_v26 = vand.u32 4294901760, %v19_v11  ;;  %v3884_v27 = vsub.f32 %v102_v22, %v3855_v31 }
 0x101   :  { %1754 = vmatpush.msrb.mxu0 %v4185_v59  ;;  %1838 = vmatpush.msrb.mxu2 %v3737_v40  ;;  %v3886_v59 = vand.u32 4294901760, %v100_v62 }
 0x102   :  { %1797 = vmatpush.msrb.mxu1 %v3444_v18  ;;  %1901 = vmatpush.msrb.mxu3 %v1900_v35  ;;  %v1918_v18 = vand.u32 4294901760, %v1917_v60  ;;  %v4187_v35 = vand.u32 4294901760, %v3828_v50  ;;  %v3900_v22 = vsub.f32 %v19_v11, %v3873_v26  ;;  %v4189_v60 = vand.u32 4294901760, %v3592_v58 }
 0x103   :  { %1758 = vmatpush.msrb.mxu0 %v4186_v32  ;;  %1840 = vmatpush.msrb.mxu2 %v3753_v6  ;;  %v3897_v32 = vsub.f32 %v101_v15, %v3871_v0  ;;  %v1946_v3 = vand.u32 4294901760, %v3884_v27  ;;  %v3911_v15 = vsub.f32 %v100_v62, %v3886_v59  ;;  %v1941_v11 = vsub.f32 %v3863_v25, %v1940_v14 }
 0x104   :  { %1799 = vmatpush.msrb.mxu1 %v3455_v54  ;;  %1907 = vmatpush.msrb.mxu3 %v1906_v45  ;;  %v1929_v43 = vsub.f32 %v3828_v50, %v4187_v35  ;;  %v1924_v54 = vand.u32 4294901760, %v1923_v23  ;;  %v1935_v45 = vsub.f32 %v3844_v16, %v1934_v51  ;;  %v1859_v23 = vand.u32 4294901760, %v3900_v22 }
 0x105   :  { %1762 = vmatpush.msrb.mxu0 %v4188_v53  ;;  %1842 = vmatpush.msrb.mxu2 %v3770_v63  ;;  %v1952_v58 = vand.u32 4294901760, %v3897_v32  ;;  %v1942_v35 = vand.u32 4294901760, %v1941_v11 }
 0x106   :  { %1801 = vmatpush.msrb.mxu1 %v3480_v48  ;;  %1913 = vmatpush.msrb.mxu3 %v1912_v57  ;;  %v1930_v48 = vand.u32 4294901760, %v1929_v43  ;;  %v4190_v57 = vand.u32 4294901760, %v3608_v10  ;;  %v1936_v62 = vand.u32 4294901760, %v1935_v45  ;;  %v1947_v10 = vsub.f32 %v3884_v27, %v1946_v3 }
 0x107   :  { %1766 = vmatpush.msrb.mxu0 %v4189_v60  ;;  %1844 = vmatpush.msrb.mxu2 %v3787_v9  ;;  %v4192_v43 = vand.u32 4294901760, %v3646_v21 }
 0x108   :  { %1803 = vmatpush.msrb.mxu1 %v3496_v19  ;;  %1919 = vmatpush.msrb.mxu3 %v1918_v18  ;;  %v4191_v19 = vand.u32 4294901760, %v3626_v17  ;;  %v1958_v18 = vand.u32 4294901760, %v3911_v15  ;;  %v1860_v17 = vsub.f32 %v3900_v22, %v1859_v23  ;;  %v1948_v21 = vand.u32 4294901760, %v1947_v10 }
 0x109   :  { %1770 = vmatpush.msrb.mxu0 %v4190_v57  ;;  %1846 = vmatpush.msrb.mxu2 %v3802_v1 }
 0x10a   :  { %1805 = vmatpush.msrb.mxu1 %v3510_v56  ;;  %1925 = vmatpush.msrb.mxu3 %v1924_v54  ;;  %v1953_v56 = vsub.f32 %v3897_v32, %v1952_v58  ;;  %v1959_v53 = vsub.f32 %v3911_v15, %v1958_v18 }
 0x10b   :  { %1774 = vmatpush.msrb.mxu0 %v4191_v19  ;;  %1848 = vmatpush.msrb.mxu2 %v3817_v61 }
 0x10c   :  { %1807 = vmatpush.msrb.mxu1 %v3526_v2  ;;  %1931 = vmatpush.msrb.mxu3 %v1930_v48  ;;  %v4193_v2 = vand.u32 4294901760, %v3674_v24  ;;  %v1954_v54 = vand.u32 4294901760, %v1953_v56  ;;  %v1960_v24 = vand.u32 4294901760, %v1959_v53 }
 0x10d   :  { %1778 = vmatpush.msrb.mxu0 %v4192_v43  ;;  %1850 = vmatpush.msrb.mxu2 %v3830_v12 }
 0x10e   :  { %1809 = vmatpush.msrb.mxu1 %v3541_v46  ;;  %1937 = vmatpush.msrb.mxu3 %v1936_v62  ;;  %v1861_v46 = vand.u32 4294901760, %v1860_v17 }
 0x10f   :  { %1782 = vmatpush.msrb.mxu0 %v4193_v2  ;;  %1852 = vmatpush.msrb.mxu2 %v3855_v31 }
 0x110   :  { %1811 = vmatpush.msrb.mxu1 %v3559_v34  ;;  %1943 = vmatpush.msrb.mxu3 %v1942_v35  ;;  %v4194_v34 = vand.u32 4294901760, %v3667_v55 }
 0x111   :  { %1784 = vmatmul.f32.vlgmr.msrb.gmra.mxu0 %v3570_v4  ;;  %1854 = vmatpush.msrb.mxu2 %v3871_v0 }
 0x112   :  { %1969 = vmatpush.msra.mxu0 %v3667_v55  ;;  %1813 = vmatpush.msrb.mxu1 %v3576_v41  ;;  %v4195_v41 = vand.u32 4294901760, %v3691_v52 }
 0x113   :  { %1949 = vmatpush.msrb.mxu3 %v1948_v21  ;;  %1856 = vmatpush.msrb.mxu2 %v3886_v59 }
 0x114   :  { %1972 = vmatpush.msra.mxu0 %v3691_v52  ;;  %1815 = vmatpush.msrb.mxu1 %v3588_v49  ;;  %v4196_v49 = vand.u32 4294901760, %v3704_v30  ;;  %v158_v52 = vpop.f32.mrf.mxu0 }
 0x115   :  { %1955 = vmatpush.msrb.mxu3 %v1954_v54  ;;  %1862 = vmatmul.f32.vlgmr.msrb.gmra.mxu2 %v1861_v46 }
 0x116   :  { %1975 = vmatpush.msra.mxu0 %v3704_v30  ;;  %2063 = vmatpush.msra.mxu2 %v4194_v34 }
 0x117   :  { %1817 = vmatpush.msrb.mxu1 %v3615_v29  ;;  %1961 = vmatpush.msrb.mxu3 %v1960_v24  ;;  %v4197_v29 = vand.u32 4294901760, %v3712_v33 }
 0x118   :  { %1963 = vmatmul.f32.vlgmr.msrb.gmra.mxu3 %v3873_v26  ;;  %1978 = vmatpush.msra.mxu0 %v3712_v33  ;;  %v4200_v33 = vand.u32 4294901760, %v3768_v20 }
 0x119   :  { %2067 = vmatpush.msra.mxu2 %v4195_v41  ;;  %2130 = vmatpush.msra.mxu3 %v3631_v47 }
 0x11a   :  { %1819 = vmatpush.msrb.mxu1 %v3640_v13  ;;  %1981 = vmatpush.msra.mxu0 %v3726_v36  ;;  %v4202_v13 = vand.u32 4294901760, %v3800_v39 }
 0x11b   :  { %1821 = vmatmul.f32.vlgmr.msrb.gmra.mxu1 %v3570_v4  ;;  %2071 = vmatpush.msra.mxu2 %v4196_v49  ;;  %v4198_v4 = vand.u32 4294901760, %v3726_v36  ;;  %v313_v36 = vpop.f32.mrf.mxu2 }
 0x11c   :  { %2022 = vmatpush.msra.mxu1 %v3631_v47  ;;  %2132 = vmatpush.msra.mxu3 %v3656_v44  ;;  %v4199_v47 = vand.u32 4294901760, %v3751_v38 }
 0x11d   :  { %1984 = vmatpush.msra.mxu0 %v3751_v38  ;;  %2075 = vmatpush.msra.mxu2 %v4197_v29 }
 0x11e   :  { %2024 = vmatpush.msra.mxu1 %v3656_v44  ;;  %2134 = vmatpush.msra.mxu3 %v3676_v28  ;;  %v259_v44 = vpop.f32.mrf.mxu1 }
 0x11f   :  { %1987 = vmatpush.msra.mxu0 %v3768_v20  ;;  %2079 = vmatpush.msra.mxu2 %v4198_v4 }
 0x120   :  { %2026 = vmatpush.msra.mxu1 %v3676_v28  ;;  %2136 = vmatpush.msra.mxu3 %v3684_v37  ;;  %v4201_v28 = vand.u32 4294901760, %v3785_v42 }
 0x121   :  { %1990 = vmatpush.msra.mxu0 %v3785_v42  ;;  %2083 = vmatpush.msra.mxu2 %v4199_v47 }
 0x122   :  { %2028 = vmatpush.msra.mxu1 %v3684_v37  ;;  %2138 = vmatpush.msra.mxu3 %v3696_v5 }
 0x123   :  { %1993 = vmatpush.msra.mxu0 %v3800_v39  ;;  %2087 = vmatpush.msra.mxu2 %v4200_v33  ;;  %v499_v42 = vpop.f32.mrf.mxu2 }
 0x124   :  { %2030 = vmatpush.msra.mxu1 %v3696_v5  ;;  %2140 = vmatpush.msra.mxu3 %v3719_v7  ;;  %v4203_v5 = vand.u32 4294901760, %v3815_v8 }
 0x125   :  { %1996 = vmatpush.msra.mxu0 %v3815_v8  ;;  %2091 = vmatpush.msra.mxu2 %v4201_v28 }
 0x126   :  { %2032 = vmatpush.msra.mxu1 %v3719_v7  ;;  %2142 = vmatpush.msra.mxu3 %v3737_v40  ;;  %v4204_v7 = vand.u32 4294901760, %v3828_v50  ;;  %v458_v20 = vpop.f32.mrf.mxu1 }
 0x127   :  { %1999 = vmatpush.msra.mxu0 %v3828_v50  ;;  %2095 = vmatpush.msra.mxu2 %v4202_v13 }
 0x128   :  { %2034 = vmatpush.msra.mxu1 %v3737_v40  ;;  %2144 = vmatpush.msra.mxu3 %v3753_v6  ;;  %v2185_v40 = vld [vmem:[%s4053_s2] ss:$0 sm:$0xff] }
 0x129   :  { %2002 = vmatpush.msra.mxu0 %v3844_v16  ;;  %2099 = vmatpush.msra.mxu2 %v4203_v5  ;;  %v159_v30 = vadd.f32 %v2185_v40, %v158_v52 }
 0x12a   :  { %2036 = vmatpush.msra.mxu1 %v3753_v6  ;;  %2146 = vmatpush.msra.mxu3 %v3770_v63  ;;  %v352_v6 = vpop.f32.mrf.mxu3 }
 0x12b   :  { %2005 = vmatpush.msra.mxu0 %v3863_v25  ;;  %2103 = vmatpush.msra.mxu2 %v4204_v7  ;;  %v260_v55 = vadd.f32 %v259_v44, %v159_v30 }
 0x12c   :  { %2038 = vmatpush.msra.mxu1 %v3770_v63  ;;  %2148 = vmatpush.msra.mxu3 %v3787_v9 }
 0x12d   :  { %2008 = vmatpush.msra.mxu0 %v3884_v27  ;;  %2107 = vmatpush.msra.mxu2 %v1934_v51  ;;  %v314_v37 = vadd.f32 %v313_v36, %v260_v55 }
 0x12e   :  { %2040 = vmatpush.msra.mxu1 %v3787_v9  ;;  %2150 = vmatpush.msra.mxu3 %v3802_v1 }
 0x12f   :  { %2011 = vmatpush.msra.mxu0 %v3897_v32  ;;  %2111 = vmatpush.msra.mxu2 %v1940_v14  ;;  %v353_v9 = vadd.f32 %v352_v6, %v314_v37  ;;  %v762_v14 = vpop.f32.mrf.mxu2 }
 0x130   :  { %2042 = vmatpush.msra.mxu1 %v3802_v1  ;;  %2152 = vmatpush.msra.mxu3 %v3817_v61 }
 0x131   :  { %2014 = vmatpush.msra.mxu0 %v3911_v15  ;;  %2115 = vmatpush.msra.mxu2 %v1946_v3 }
 0x132   :  { %2044 = vmatpush.msra.mxu1 %v3817_v61  ;;  %2154 = vmatpush.msra.mxu3 %v3830_v12  ;;  %v600_v39 = vpop.f32.mrf.mxu3  ;;  %v693_v61 = vpop.f32.mrf.mxu1 }
 0x133   :  { %2017 = vmatmul.f32.vlgmr.msra.gmra.mxu0 %v3900_v22  ;;  %2119 = vmatpush.msra.mxu2 %v1952_v58 }
 0x134   :  { %2046 = vmatpush.msra.mxu1 %v3830_v12  ;;  %2156 = vmatpush.msra.mxu3 %v3855_v31  ;;  %v421_v12 = vpop.f32.mrf.mxu0 }
 0x135   :  { %2123 = vmatpush.msra.mxu2 %v1958_v18  ;;  %v422_v38 = vadd.f32 %v421_v12, %v353_v9 }
 0x136   :  { %2048 = vmatpush.msra.mxu1 %v3855_v31  ;;  %2158 = vmatpush.msra.mxu3 %v3871_v0 }
 0x137   :  { %2125 = vmatmul.f32.vlgmr.msra.gmra.mxu2 %v3873_v26  ;;  %v459_v63 = vadd.f32 %v458_v20, %v422_v38  ;;  %v995_v22 = vpop.f32.mrf.mxu2 }
 0x138   :  { %2050 = vmatpush.msra.mxu1 %v3871_v0  ;;  %2160 = vmatpush.msra.mxu3 %v3886_v59 }
 0x139   :  { %2162 = vmatmul.f32.vlgmr.msra.gmra.mxu3 %v3873_v26  ;;  %v500_v25 = vadd.f32 %v499_v42, %v459_v63 }
 0x13a   :  { %2052 = vmatpush.msra.mxu1 %v3886_v59  ;;  %v799_v31 = vpop.f32.mrf.mxu3  ;;  %v941_v27 = vpop.f32.mrf.mxu1 }
 0x13b   :  { %2056 = vmatmul.f32.vlgmr.msra.gmra.mxu1 %v1859_v23  ;;  %v601_v8 = vadd.f32 %v600_v39, %v500_v25 }
 0x13c   :  { %v654_v1 = vpop.f32.mrf.mxu0 }
 0x13d   :  { %v655_v51 = vadd.f32 %v654_v1, %v601_v8 }
 0x13f   :  { %v694_v50 = vadd.f32 %v693_v61, %v655_v51  ;;  %v1181_v58 = vpop.f32.mrf.mxu2 }
 0x141   :  { %v763_v16 = vadd.f32 %v762_v14, %v694_v50 }
 0x142   :  { %v1034_v60 = vpop.f32.mrf.mxu3  ;;  %v1140_v48 = vpop.f32.mrf.mxu1 }
 0x143   :  { %v800_v26 = vadd.f32 %v799_v31, %v763_v16 }
 0x144   :  { %v840_v0 = vpop.f32.mrf.mxu0 }
 0x145   :  { %v841_v59 = vadd.f32 %v840_v0, %v800_v26 }
 0x147   :  { %v942_v32 = vadd.f32 %v941_v27, %v841_v59 }
 0x149   :  { %v996_v45 = vadd.f32 %v995_v22, %v942_v32 }
 0x14a   :  { %v1282_v62 = vpop.f32.mrf.mxu3 }
 0x14b   :  { %v1035_v15 = vadd.f32 %v1034_v60, %v996_v45 }
 0x14c   :  { %v1103_v3 = vpop.f32.mrf.mxu0 }
 0x14d   :  { %v1104_v11 = vadd.f32 %v1103_v3, %v1035_v15 }
 0x14f   :  { %v1141_v57 = vadd.f32 %v1140_v48, %v1104_v11 }
 0x151   :  { %v1182_v23 = vadd.f32 %v1181_v58, %v1141_v57 }
 0x153   :  { %v1283_v10 = vadd.f32 %v1282_v62, %v1182_v23  ;;  %v1375_v18 = vpop.f32.mrf.mxu1 }
 0x154   :  { %v1336_v19 = vpop.f32.mrf.mxu0  ;;  %v1444_v56 = vpop.f32.mrf.mxu2 }
 0x155   :  { %v1337_v35 = vadd.f32 %v1336_v19, %v1283_v10 }
 0x157   :  { %v1376_v43 = vadd.f32 %v1375_v18, %v1337_v35  ;;  %v1481_v2 = vpop.f32.mrf.mxu3 }
 0x159   :  { %v1445_v17 = vadd.f32 %v1444_v56, %v1376_v43 }
 0x15b   :  { %v1482_v53 = vadd.f32 %v1481_v2, %v1445_v17 }
 0x16b   :  { %v1522_v21 = vpop.f32.mrf.mxu0 }
 0x16c   :  { %v1523_v46 = vadd.f32 %v1522_v21, %v1482_v53 }
 0x175   :  { %v1623_v54 = vpop.f32.mrf.mxu1 }
 0x176   :  { %v1624_v24 = vadd.f32 %v1623_v54, %v1523_v46  ;;  %v1677_v34 = vpop.f32.mrf.mxu2 }
 0x178   :  { %v1678_v41 = vadd.f32 %v1677_v34, %v1624_v24 }
 0x179   :  { %v1716_v49 = vpop.f32.mrf.mxu3 }
 0x17a   :  { %v1717_v4 = vadd.f32 %v1716_v49, %v1678_v41 }
 0x18e   :  { %v1785_v29 = vpop.f32.mrf.mxu0 }
 0x18f   :  { %v1786_v33 = vadd.f32 %v1785_v29, %v1717_v4 }
 0x198   :  { %v1822_v47 = vpop.f32.mrf.mxu1  ;;  %v1863_v13 = vpop.f32.mrf.mxu2 }
 0x199   :  { %v1823_v28 = vadd.f32 %v1822_v47, %v1786_v33 }
 0x19b   :  { %v1864_v5 = vadd.f32 %v1863_v13, %v1823_v28  ;;  %v1964_v7 = vpop.f32.mrf.mxu3 }
 0x19d   :  { %v1965_v52 = vadd.f32 %v1964_v7, %v1864_v5 }
 0x1b0   :  { %v2018_v40 = vpop.f32.mrf.mxu0 }
 0x1b1   :  { %v2019_v30 = vadd.f32 %v2018_v40, %v1965_v52 }
 0x1b8   :  { %v2057_v44 = vpop.f32.mrf.mxu1 }
 0x1b9   :  { %v2058_v55 = vadd.f32 %v2057_v44, %v2019_v30 }
 0x1ba   :  { %v2126_v36 = vpop.f32.mrf.mxu2 }
 0x1bb   :  { %v2127_v37 = vadd.f32 %v2126_v36, %v2058_v55 }
 0x1bc   :  { %v2163_v6 = vpop.f32.mrf.mxu3 }
 0x1bd   :  { %v2164_v9 = vadd.f32 %v2163_v6, %v2127_v37 }
 0x1bf   :  { %v2167_v12 = vsel %vm2166_vm0, %v2164_v9, -inf }
 0x1c0   :  { %2168 = vmax.xlane.f32.xlu0 %v2167_v12 }
 0x233   :  { %v2169_v38 = vpop.xlane.xlu0 %2168 }
 0x234   :  { %v2170_v20 = vsub.f32 %v2164_v9, %v2169_v38 }
 0x236   :  { %v2171_v63 = vmul.f32 1.442695, %v2170_v20 }
 0x238   :  { %2186 = vpow2.f32 %v2171_v63 }
 0x23e   :  { %v2187_v42 = vpop.eup %2186 }
 0x23f   :  { %v2173_v25 = vsel %vm2166_vm0, %v2187_v42, 0.0 }
 0x240   :  { %2174 = vadd.xlane.f32.xlu0 %v2173_v25 }
 0x2b3   :  { %v2175_v39 = vpop.xlane.xlu0 %2174 }
 0x2b4   :  { %2188 = vlog2.f32 %v2175_v39 }
 0x2ba   :  { %v2189_v1 = vpop.eup %2188 }
 0x2bb   :  { %v2177_v8 = vmul.f32 0.6931472, %v2189_v1 }
 0x2bd   :  { %v2178_v61 = vadd.f32 %v2177_v8, %v2169_v38 }
 0x2bf   :  { %v2179_v51 = vsub.f32 %v2164_v9, %v2178_v61 }
 0x2c1   :  { %2180 = vst.msk [vmem:[%s4054_s3] sm:$0xff] %vm2166_vm0, %v2179_v51 }

</bundles_post_ra>
